<compile_context>
chip_gen: v7x
topology: tpu7x:2x2x1
jax: 0.10.0
libtpu: 0.0.40
codegen_flags: <defaults>
</compile_context>

<pallas_src>
import functools

import jax
import jax.numpy as jnp
from jax import lax
from jax.experimental import pallas as pl
from jax.experimental.pallas import tpu as pltpu

BN_EPS = 1e-5
LANES = 128                 # lane-dense channel padding for the conv output
MXU_DTYPE = jnp.bfloat16    # bf16 MXU inputs, f32 accumulation


def conv_stats_kernel(x_ref, w_ref, y_ref, stats_ref, *, s_h, s_w):
    """Fused nearest-upsample + pad + 3x3 conv + partial BN stats, one image.

    x_ref    : (1, H, W, Cin)      bf16  ORIGINAL image (un-upsampled, unpadded)
    w_ref    : (3, 3*Cin, Cp)      bf16  per-dy flattened taps (dx*Cin + ci)
    y_ref    : (1, Ho*Wo, Cp)      bf16  pre-BN conv output (lane dense)
    stats_ref: (1, 2, Cp)          f32   [sum, sum((x - image_mean)^2)]
    """
    _, h, w, cin = x_ref.shape
    ho, wo = h * s_h, w * s_w
    hw = ho * wo
    cp = y_ref.shape[-1]

    x = x_ref[0]                                        # (H, W, Cin) bf16
    # Nearest upsample by integer scale, entirely in VMEM (s == 1 -> no-op).
    if s_h > 1:
        x = jnp.broadcast_to(x[:, None, :, :], (h, s_h, w, cin)).reshape(ho, w, cin)
    if s_w > 1:
        x = jnp.broadcast_to(x[:, :, None, :], (ho, w, s_w, cin)).reshape(ho, wo, cin)
    # Zero pad H and W by 1 (bf16, VMEM only) via concatenation.
    zr = jnp.zeros((1, wo, cin), x.dtype)
    x = jnp.concatenate([zr, x, zr], axis=0)            # (Ho+2, Wo, Cin)
    zc = jnp.zeros((ho + 2, 1, cin), x.dtype)
    x = jnp.concatenate([zc, x, zc], axis=1)            # (Ho+2, Wo+2, Cin)

    # 3x3 conv = 3 accumulated MXU matmuls (one per dy row-group, K = 3*Cin).
    # Taps stay bf16; accumulation is f32.  No 9x patches slab is ever live.
    acc = jnp.zeros((hw, cp), jnp.float32)
    for dy in range(3):
        taps = jnp.concatenate(
            [x[dy:dy + ho, dx:dx + wo, :] for dx in range(3)], axis=-1)  # (Ho, Wo, 3*Cin)
        acc = acc + jnp.dot(taps.reshape(hw, 3 * cin), w_ref[dy],
                            preferred_element_type=jnp.float32)          # (HW, Cp)

    y_ref[0] = acc.astype(y_ref.dtype)                  # bf16 writeback

    # Per-image partial BN stats: sum + squared deviations about the image
    # mean (numerically stable parallel-variance combine happens outside).
    s = jnp.sum(acc, axis=0, keepdims=True)             # (1, Cp)
    m = s * (1.0 / hw)
    d = acc - m
    ssd = jnp.sum(d * d, axis=0, keepdims=True)         # (1, Cp)
    stats_ref[0] = jnp.concatenate([s, ssd], axis=0)    # (2, Cp)


def bn_relu_kernel(y_ref, scale_ref, shift_ref, o_ref):
    """Folded BatchNorm (per-channel scale/shift) + ReLU, lane dense, bf16 I/O."""
    z = y_ref[...].astype(jnp.float32) * scale_ref[...] + shift_ref[...]
    o_ref[...] = jnp.maximum(z, 0.0).astype(o_ref.dtype)


def _round_up(x, m):
    return (x + m - 1) // m * m


@functools.partial(jax.jit, static_argnames=("size_out",))
def up_conv_forward(x_nchw, w, b, gamma, beta, size_out):
    n, c_in, h, w_in = x_nchw.shape
    c_out = w.shape[0]
    ho, wo = size_out
    hw = ho * wo
    cp = _round_up(c_out, LANES)        # lane-dense padded output channels

    # --- cheap glue: NCHW -> NHWC + bf16 cast (no upsampled HBM tensor) -----
    x_nhwc = jnp.transpose(x_nchw, (0, 2, 3, 1)).astype(MXU_DTYPE)
    if ho % h == 0 and wo % w_in == 0:
        s_h, s_w = ho // h, wo // w_in          # integer scale: fuse in-kernel
        x_in, hi, wi = x_nhwc, h, w_in
    else:
        # TODO(synk): fold non-integer nearest upsampling into the kernel via
        # scalar-prefetched row/col tables; for now fall back to a wrapper gather.
        ih = (jnp.arange(ho) * h) // ho
        iw = (jnp.arange(wo) * w_in) // wo
        x_in = x_nhwc[:, ih[:, None], iw[None, :], :]
        s_h = s_w = 1
        hi, wi = ho, wo

    # (Cout, Cin, 3, 3) -> (3, 3, Cin, Cout) -> (3, 3*Cin, Cout) -> pad lanes.
    w9 = jnp.transpose(w, (2, 3, 1, 0)).reshape(3, 3 * c_in, c_out)
    w9 = jnp.pad(w9, ((0, 0), (0, 0), (0, cp - c_out))).astype(MXU_DTYPE)

    # Conv bias dropped: training-mode BatchNorm subtracts the batch mean
    # immediately afterwards, so a per-channel constant cancels exactly.
    del b

    # --- pass 1: fused upsample/pad + conv + partial BN stats ---------------
    kernel1 = functools.partial(conv_stats_kernel, s_h=s_h, s_w=s_w)
    cost1 = pl.CostEstimate(
        flops=2 * n * hw * 9 * c_in * cp,
        transcendentals=0,
        bytes_accessed=(x_in.size * 2 + w9.size * 2
                        + n * hw * cp * 2 + n * 2 * cp * 4))
    y, stats = pl.pallas_call(
        kernel1,
        grid=(n,),
        in_specs=[
            pl.BlockSpec((1, hi, wi, c_in), lambda i: (i, 0, 0, 0)),
            pl.BlockSpec((3, 3 * c_in, cp), lambda i: (0, 0, 0)),
        ],
        out_specs=(
            pl.BlockSpec((1, hw, cp), lambda i: (i, 0, 0)),
            pl.BlockSpec((1, 2, cp), lambda i: (i, 0, 0)),
        ),
        out_shape=(
            jax.ShapeDtypeStruct((n, hw, cp), MXU_DTYPE),     # bf16 intermediate
            jax.ShapeDtypeStruct((n, 2, cp), jnp.float32),
        ),
        compiler_params=pltpu.CompilerParams(
            dimension_semantics=("parallel",),
            vmem_limit_bytes=64 * 1024 * 1024),
        cost_estimate=cost1,
    )(x_in, w9)

    # --- combine per-image partials (parallel-variance merge, stable) -------
    sum_i = stats[:, 0, :]                       # (n, Cp)
    ssd_i = stats[:, 1, :]                       # (n, Cp)
    mean_i = sum_i / hw
    mean = jnp.mean(mean_i, axis=0)              # equal counts per image
    m2 = jnp.sum(ssd_i, axis=0) + hw * jnp.sum((mean_i - mean) ** 2, axis=0)
    var = m2 / (n * hw)                          # biased (PyTorch BN normalize)
    gamma_p = jnp.pad(gamma.astype(jnp.float32), (0, cp - c_out))
    beta_p = jnp.pad(beta.astype(jnp.float32), (0, cp - c_out))
    inv_std = lax.rsqrt(var + BN_EPS)
    scale = (gamma_p * inv_std).reshape(1, cp)
    shift = (beta_p - mean * gamma_p * inv_std).reshape(1, cp)

    # --- pass 2: normalize + ReLU, aliasing y's HBM buffer as the output ----
    cost2 = pl.CostEstimate(
        flops=3 * n * hw * cp,
        transcendentals=0,
        bytes_accessed=2 * n * hw * cp * 2 + 2 * cp * 4)
    out = pl.pallas_call(
        bn_relu_kernel,
        grid=(n,),
        in_specs=[
            pl.BlockSpec((1, hw, cp), lambda i: (i, 0, 0)),
            pl.BlockSpec((1, cp), lambda i: (0, 0)),
            pl.BlockSpec((1, cp), lambda i: (0, 0)),
        ],
        out_specs=pl.BlockSpec((1, hw, cp), lambda i: (i, 0, 0)),
        out_shape=jax.ShapeDtypeStruct((n, hw, cp), MXU_DTYPE),
        input_output_aliases={0: 0},             # reuse y's buffer in place
        compiler_params=pltpu.CompilerParams(
            dimension_semantics=("parallel",),
            vmem_limit_bytes=64 * 1024 * 1024),
        cost_estimate=cost2,
    )(y, scale, shift)

    # back to NCHW, drop the lane padding (single fused XLA pass)
    out = out[:, :, :c_out].astype(jnp.float32).reshape(n, ho, wo, c_out)
    return jnp.transpose(out, (0, 3, 1, 2))


def reference_forward(x_nchw, w, b, gamma, beta, size_out):
    """Pure-JAX f32 reference (same semantics as the PyTorch module, train mode)."""
    n, c, h, w_in = x_nchw.shape
    ho, wo = size_out
    ih = (jnp.arange(ho) * h) // ho
    iw = (jnp.arange(wo) * w_in) // wo
    xu = x_nchw[:, :, ih[:, None], iw[None, :]]
    y = lax.conv_general_dilated(
        xu, w, window_strides=(1, 1), padding=((1, 1), (1, 1)),
        dimension_numbers=("NCHW", "OIHW", "NCHW"))
    y = y + b.reshape(1, -1, 1, 1)
    mean = jnp.mean(y, axis=(0, 2, 3), keepdims=True)
    var = jnp.var(y, axis=(0, 2, 3), keepdims=True)
    y = (y - mean) * lax.rsqrt(var + BN_EPS)
    y = y * gamma.reshape(1, -1, 1, 1) + beta.reshape(1, -1, 1, 1)
    return jnp.maximum(y, 0.0)


if __name__ == "__main__":
    # up_conv(ch_in=4, ch_out=8, size_out=(16, 16)), input (2, 4, 8, 8)
    ch_in, ch_out = 4, 8
    size_out = (16, 16)
    n, h_in, w_in = 2, 4, 8  # placeholder, fixed below
    n, h_in, w_in = 2, 8, 8

    key = jax.random.PRNGKey(0)
    kx, kw, kb = jax.random.split(key, 3)

    x = jax.random.normal(kx, (n, ch_in, h_in, w_in), dtype=jnp.float32)
    fan_in = ch_in * 3 * 3
    bound = 1.0 / (fan_in ** 0.5)
    w = jax.random.uniform(kw, (ch_out, ch_in, 3, 3),
                           minval=-bound, maxval=bound, dtype=jnp.float32)
    b = jax.random.uniform(kb, (ch_out,),
                           minval=-bound, maxval=bound, dtype=jnp.float32)
    gamma = jnp.ones((ch_out,), jnp.float32)   # BatchNorm2d default init
    beta = jnp.zeros((ch_out,), jnp.float32)

    out = up_conv_forward(x, w, b, gamma, beta, size_out)
    out = jax.block_until_ready(out)

    ref = reference_forward(x, w, b, gamma, beta, size_out)
    assert out.shape == (n, ch_out, size_out[0], size_out[1])
    # bf16 MXU inputs / bf16 intermediates (f32 accumulation), so compare
    # against the pure-f32 reference at a bf16-rounding-level tolerance.
    err = float(jnp.max(jnp.abs(out - ref)))
    assert jnp.allclose(out, ref, atol=5e-2, rtol=5e-2), err

    print("KERNEL_OK")
</pallas_src>

<mosaic_0001>
module attributes {stable_mosaic.version = 11 : i64} {
  func.func @conv_stats_kernel(%arg0: i32, %arg1: memref<1x8x8x4xbf16, #tpu.memory_space<vmem>>, %arg2: memref<3x12x128xbf16, #tpu.memory_space<vmem>>, %arg3: memref<1x256x128xbf16, #tpu.memory_space<vmem>>, %arg4: memref<1x2x128xf32, #tpu.memory_space<vmem>>) attributes {dimension_semantics = [#tpu.dimension_semantics<parallel>], iteration_bounds = array<i64: 2>, scalar_prefetch = 0 : i64, scratch_operands = 0 : i64, tpu.core_type = #tpu.core_type<tc>, window_params = [{transform_indices = @transform_0, window_bounds = array<i64: 1, 8, 8, 4>}, {pipeline_mode = #tpu.pipeline_mode<synchronous>, transform_indices = @transform_1, window_bounds = array<i64: 3, 12, 128>}, {transform_indices = @transform_2, window_bounds = array<i64: 1, 256, 128>}, {transform_indices = @transform_3, window_bounds = array<i64: 1, 2, 128>}]} {
    %c0 = arith.constant 0 : index
    %c0_0 = arith.constant 0 : index
    %c0_1 = arith.constant 0 : index
    %c0_2 = arith.constant 0 : index
    %0 = vector.load %arg1[%c0, %c0_0, %c0_1, %c0_2] : memref<1x8x8x4xbf16, #tpu.memory_space<vmem>>, vector<1x8x8x4xbf16>
    %1 = vector.shape_cast %0 : vector<1x8x8x4xbf16> to vector<8x8x4xbf16>
    %2 = vector.shape_cast %1 : vector<8x8x4xbf16> to vector<8x1x8x4xbf16>
    %3 = vector.shape_cast %2 : vector<8x1x8x4xbf16> to vector<8x1x8x4xbf16>
    %4 = vector.broadcast %3 : vector<8x1x8x4xbf16> to vector<8x2x8x4xbf16>
    %5 = vector.shape_cast %4 : vector<8x2x8x4xbf16> to vector<16x8x4xbf16>
    %6 = vector.shape_cast %5 : vector<16x8x4xbf16> to vector<16x8x1x4xbf16>
    %7 = vector.shape_cast %6 : vector<16x8x1x4xbf16> to vector<16x8x1x4xbf16>
    %8 = vector.broadcast %7 : vector<16x8x1x4xbf16> to vector<16x8x2x4xbf16>
    %9 = vector.shape_cast %8 : vector<16x8x2x4xbf16> to vector<16x16x4xbf16>
    %cst = arith.constant 0.000000e+00 : bf16
    %10 = vector.broadcast %cst : bf16 to vector<1x16x4xbf16>
    %11 = tpu.concatenate %10, %9, %10 in 0 : vector<1x16x4xbf16>, vector<16x16x4xbf16>, vector<1x16x4xbf16> -> vector<18x16x4xbf16>
    %cst_3 = arith.constant 0.000000e+00 : bf16
    %12 = vector.broadcast %cst_3 : bf16 to vector<18x1x4xbf16>
    %13 = tpu.concatenate %12, %11, %12 in 1 : vector<18x1x4xbf16>, vector<18x16x4xbf16>, vector<18x1x4xbf16> -> vector<18x18x4xbf16>
    %cst_4 = arith.constant 0.000000e+00 : f32
    %14 = vector.broadcast %cst_4 : f32 to vector<256x128xf32>
    %15 = vector.extract_strided_slice %13 {offsets = [0, 0, 0], sizes = [16, 16, 4], strides = [1, 1, 1]} : vector<18x18x4xbf16> to vector<16x16x4xbf16>
    %16 = vector.extract_strided_slice %13 {offsets = [0, 1, 0], sizes = [16, 16, 4], strides = [1, 1, 1]} : vector<18x18x4xbf16> to vector<16x16x4xbf16>
    %17 = vector.extract_strided_slice %13 {offsets = [0, 2, 0], sizes = [16, 16, 4], strides = [1, 1, 1]} : vector<18x18x4xbf16> to vector<16x16x4xbf16>
    %18 = tpu.concatenate %15, %16, %17 in 2 : vector<16x16x4xbf16>, vector<16x16x4xbf16>, vector<16x16x4xbf16> -> vector<16x16x12xbf16>
    %19 = vector.shape_cast %18 : vector<16x16x12xbf16> to vector<256x12xbf16>
    %c0_5 = arith.constant 0 : index
    %c0_6 = arith.constant 0 : index
    %c0_7 = arith.constant 0 : index
    %20 = vector.load %arg2[%c0_5, %c0_6, %c0_7] : memref<3x12x128xbf16, #tpu.memory_space<vmem>>, vector<1x12x128xbf16>
    %21 = vector.shape_cast %20 : vector<1x12x128xbf16> to vector<12x128xbf16>
    %cst_8 = arith.constant dense<0.000000e+00> : vector<256x128xf32>
    %22 = tpu.matmul %19, %21, %cst_8 {dimension_numbers = #tpu.dot_dimension_numbers<[1], [0], [0], [1], [0, 0, 1, 1], [], []>} : vector<256x12xbf16>, vector<12x128xbf16>, vector<256x128xf32> -> vector<256x128xf32>
    %23 = arith.addf %14, %22 : vector<256x128xf32>
    %24 = vector.extract_strided_slice %13 {offsets = [1, 0, 0], sizes = [16, 16, 4], strides = [1, 1, 1]} : vector<18x18x4xbf16> to vector<16x16x4xbf16>
    %25 = vector.extract_strided_slice %13 {offsets = [1, 1, 0], sizes = [16, 16, 4], strides = [1, 1, 1]} : vector<18x18x4xbf16> to vector<16x16x4xbf16>
    %26 = vector.extract_strided_slice %13 {offsets = [1, 2, 0], sizes = [16, 16, 4], strides = [1, 1, 1]} : vector<18x18x4xbf16> to vector<16x16x4xbf16>
    %27 = tpu.concatenate %24, %25, %26 in 2 : vector<16x16x4xbf16>, vector<16x16x4xbf16>, vector<16x16x4xbf16> -> vector<16x16x12xbf16>
    %28 = vector.shape_cast %27 : vector<16x16x12xbf16> to vector<256x12xbf16>
    %c1 = arith.constant 1 : index
    %c0_9 = arith.constant 0 : index
    %c0_10 = arith.constant 0 : index
    %29 = vector.load %arg2[%c1, %c0_9, %c0_10] : memref<3x12x128xbf16, #tpu.memory_space<vmem>>, vector<1x12x128xbf16>
    %30 = vector.shape_cast %29 : vector<1x12x128xbf16> to vector<12x128xbf16>
    %cst_11 = arith.constant dense<0.000000e+00> : vector<256x128xf32>
    %31 = tpu.matmul %28, %30, %cst_11 {dimension_numbers = #tpu.dot_dimension_numbers<[1], [0], [0], [1], [0, 0, 1, 1], [], []>} : vector<256x12xbf16>, vector<12x128xbf16>, vector<256x128xf32> -> vector<256x128xf32>
    %32 = arith.addf %23, %31 : vector<256x128xf32>
    %33 = vector.extract_strided_slice %13 {offsets = [2, 0, 0], sizes = [16, 16, 4], strides = [1, 1, 1]} : vector<18x18x4xbf16> to vector<16x16x4xbf16>
    %34 = vector.extract_strided_slice %13 {offsets = [2, 1, 0], sizes = [16, 16, 4], strides = [1, 1, 1]} : vector<18x18x4xbf16> to vector<16x16x4xbf16>
    %35 = vector.extract_strided_slice %13 {offsets = [2, 2, 0], sizes = [16, 16, 4], strides = [1, 1, 1]} : vector<18x18x4xbf16> to vector<16x16x4xbf16>
    %36 = tpu.concatenate %33, %34, %35 in 2 : vector<16x16x4xbf16>, vector<16x16x4xbf16>, vector<16x16x4xbf16> -> vector<16x16x12xbf16>
    %37 = vector.shape_cast %36 : vector<16x16x12xbf16> to vector<256x12xbf16>
    %c2 = arith.constant 2 : index
    %c0_12 = arith.constant 0 : index
    %c0_13 = arith.constant 0 : index
    %38 = vector.load %arg2[%c2, %c0_12, %c0_13] : memref<3x12x128xbf16, #tpu.memory_space<vmem>>, vector<1x12x128xbf16>
    %39 = vector.shape_cast %38 : vector<1x12x128xbf16> to vector<12x128xbf16>
    %cst_14 = arith.constant dense<0.000000e+00> : vector<256x128xf32>
    %40 = tpu.matmul %37, %39, %cst_14 {dimension_numbers = #tpu.dot_dimension_numbers<[1], [0], [0], [1], [0, 0, 1, 1], [], []>} : vector<256x12xbf16>, vector<12x128xbf16>, vector<256x128xf32> -> vector<256x128xf32>
    %41 = arith.addf %32, %40 : vector<256x128xf32>
    %42 = arith.truncf %41 : vector<256x128xf32> to vector<256x128xbf16>
    %c0_15 = arith.constant 0 : index
    %c0_16 = arith.constant 0 : index
    %c0_17 = arith.constant 0 : index
    %43 = vector.load %arg3[%c0_15, %c0_16, %c0_17] : memref<1x256x128xbf16, #tpu.memory_space<vmem>>, vector<1x256x128xbf16>
    %44 = vector.shape_cast %43 : vector<1x256x128xbf16> to vector<256x128xbf16>
    %45 = vector.shape_cast %42 : vector<256x128xbf16> to vector<1x256x128xbf16>
    tpu.vector_store %arg3[%c0_15, %c0_16, %c0_17], %45 {strides = array<i32>} : memref<1x256x128xbf16, #tpu.memory_space<vmem>>, vector<1x256x128xbf16>,
    %cst_18 = arith.constant dense<0.000000e+00> : vector<128xf32>
    %46 = vector.multi_reduction <add>, %41, %cst_18 [0] : vector<256x128xf32> to vector<128xf32>
    %47 = vector.shape_cast %46 : vector<128xf32> to vector<1x128xf32>
    %cst_19 = arith.constant 3.906250e-03 : f32
    %48 = vector.broadcast %cst_19 : f32 to vector<1x128xf32>
    %49 = arith.mulf %47, %48 : vector<1x128xf32>
    %50 = vector.broadcast %49 : vector<1x128xf32> to vector<256x128xf32>
    %51 = arith.subf %41, %50 : vector<256x128xf32>
    %52 = arith.mulf %51, %51 : vector<256x128xf32>
    %cst_20 = arith.constant dense<0.000000e+00> : vector<128xf32>
    %53 = vector.multi_reduction <add>, %52, %cst_20 [0] : vector<256x128xf32> to vector<128xf32>
    %54 = vector.shape_cast %53 : vector<128xf32> to vector<1x128xf32>
    %55 = tpu.concatenate %47, %54 in 0 : vector<1x128xf32>, vector<1x128xf32> -> vector<2x128xf32>
    %c0_21 = arith.constant 0 : index
    %c0_22 = arith.constant 0 : index
    %c0_23 = arith.constant 0 : index
    %56 = vector.load %arg4[%c0_21, %c0_22, %c0_23] : memref<1x2x128xf32, #tpu.memory_space<vmem>>, vector<1x2x128xf32>
    %57 = vector.shape_cast %56 : vector<1x2x128xf32> to vector<2x128xf32>
    %58 = vector.shape_cast %55 : vector<2x128xf32> to vector<1x2x128xf32>
    tpu.vector_store %arg4[%c0_21, %c0_22, %c0_23], %58 {strides = array<i32>} : memref<1x2x128xf32, #tpu.memory_space<vmem>>, vector<1x2x128xf32>,
    return
  }
  func.func @transform_0(%arg0: i32) -> (i32, i32, i32, i32) {
    %c0_i32 = arith.constant 0 : i32
    %c0_i32_0 = arith.constant 0 : i32
    %c0_i32_1 = arith.constant 0 : i32
    %c0_i32_2 = arith.constant 0 : i32
    return %arg0, %c0_i32, %c0_i32_0, %c0_i32_1 : i32, i32, i32, i32
  }
  func.func @transform_1(%arg0: i32) -> (i32, i32, i32) {
    %c0_i32 = arith.constant 0 : i32
    %c0_i32_0 = arith.constant 0 : i32
    %c0_i32_1 = arith.constant 0 : i32
    %c0_i32_2 = arith.constant 0 : i32
    return %c0_i32, %c0_i32_0, %c0_i32_1 : i32, i32, i32
  }
  func.func @transform_2(%arg0: i32) -> (i32, i32, i32) {
    %c0_i32 = arith.constant 0 : i32
    %c0_i32_0 = arith.constant 0 : i32
    %c0_i32_1 = arith.constant 0 : i32
    return %arg0, %c0_i32, %c0_i32_0 : i32, i32, i32
  }
  func.func @transform_3(%arg0: i32) -> (i32, i32, i32) {
    %c0_i32 = arith.constant 0 : i32
    %c0_i32_0 = arith.constant 0 : i32
    %c0_i32_1 = arith.constant 0 : i32
    return %arg0, %c0_i32, %c0_i32_0 : i32, i32, i32
  }
}

module attributes {stable_mosaic.version = 11 : i64} {
  func.func @bn_relu_kernel(%arg0: i32, %arg1: memref<1x256x128xbf16, #tpu.memory_space<vmem>>, %arg2: memref<1x128xf32, #tpu.memory_space<vmem>>, %arg3: memref<1x128xf32, #tpu.memory_space<vmem>>, %arg4: memref<1x256x128xbf16, #tpu.memory_space<vmem>>) attributes {dimension_semantics = [#tpu.dimension_semantics<parallel>], iteration_bounds = array<i64: 2>, scalar_prefetch = 0 : i64, scratch_operands = 0 : i64, tpu.core_type = #tpu.core_type<tc>, window_params = [{transform_indices = @transform_0, window_bounds = array<i64: 1, 256, 128>}, {pipeline_mode = #tpu.pipeline_mode<synchronous>, transform_indices = @transform_1, window_bounds = array<i64: 1, 128>}, {pipeline_mode = #tpu.pipeline_mode<synchronous>, transform_indices = @transform_2, window_bounds = array<i64: 1, 128>}, {transform_indices = @transform_3, window_bounds = array<i64: 1, 256, 128>}]} {
    %c0 = arith.constant 0 : index
    %c0_0 = arith.constant 0 : index
    %c0_1 = arith.constant 0 : index
    %0 = vector.load %arg1[%c0, %c0_0, %c0_1] : memref<1x256x128xbf16, #tpu.memory_space<vmem>>, vector<1x256x128xbf16>
    %1 = arith.extf %0 : vector<1x256x128xbf16> to vector<1x256x128xf32>
    %c0_2 = arith.constant 0 : index
    %c0_3 = arith.constant 0 : index
    %2 = vector.load %arg2[%c0_2, %c0_3] : memref<1x128xf32, #tpu.memory_space<vmem>>, vector<1x128xf32>
    %3 = vector.shape_cast %2 : vector<1x128xf32> to vector<1x1x128xf32>
    %4 = vector.broadcast %3 : vector<1x1x128xf32> to vector<1x256x128xf32>
    %5 = arith.mulf %1, %4 : vector<1x256x128xf32>
    %c0_4 = arith.constant 0 : index
    %c0_5 = arith.constant 0 : index
    %6 = vector.load %arg3[%c0_4, %c0_5] : memref<1x128xf32, #tpu.memory_space<vmem>>, vector<1x128xf32>
    %7 = vector.shape_cast %6 : vector<1x128xf32> to vector<1x1x128xf32>
    %8 = vector.broadcast %7 : vector<1x1x128xf32> to vector<1x256x128xf32>
    %9 = arith.addf %5, %8 : vector<1x256x128xf32>
    %cst = arith.constant 0.000000e+00 : f32
    %10 = vector.broadcast %cst : f32 to vector<1x256x128xf32>
    %11 = arith.maximumf %9, %10 : vector<1x256x128xf32>
    %12 = arith.truncf %11 : vector<1x256x128xf32> to vector<1x256x128xbf16>
    %c0_6 = arith.constant 0 : index
    %c0_7 = arith.constant 0 : index
    %c0_8 = arith.constant 0 : index
    %13 = vector.load %arg4[%c0_6, %c0_7, %c0_8] : memref<1x256x128xbf16, #tpu.memory_space<vmem>>, vector<1x256x128xbf16>
    tpu.vector_store %arg4[%c0_6, %c0_7, %c0_8], %12 {strides = array<i32>} : memref<1x256x128xbf16, #tpu.memory_space<vmem>>, vector<1x256x128xbf16>,
    return
  }
  func.func @transform_0(%arg0: i32) -> (i32, i32, i32) {
    %c0_i32 = arith.constant 0 : i32
    %c0_i32_0 = arith.constant 0 : i32
    %c0_i32_1 = arith.constant 0 : i32
    return %arg0, %c0_i32, %c0_i32_0 : i32, i32, i32
  }
  func.func @transform_1(%arg0: i32) -> (i32, i32) {
    %c0_i32 = arith.constant 0 : i32
    %c0_i32_0 = arith.constant 0 : i32
    %c0_i32_1 = arith.constant 0 : i32
    return %c0_i32, %c0_i32_0 : i32, i32
  }
  func.func @transform_2(%arg0: i32) -> (i32, i32) {
    %c0_i32 = arith.constant 0 : i32
    %c0_i32_0 = arith.constant 0 : i32
    %c0_i32_1 = arith.constant 0 : i32
    return %c0_i32, %c0_i32_0 : i32, i32
  }
  func.func @transform_3(%arg0: i32) -> (i32, i32, i32) {
    %c0_i32 = arith.constant 0 : i32
    %c0_i32_0 = arith.constant 0 : i32
    %c0_i32_1 = arith.constant 0 : i32
    return %arg0, %c0_i32, %c0_i32_0 : i32, i32, i32
  }
}

</mosaic_0001>

<bundles_post_ra>
// kernel: up_conv_forward.3
= control target key start
LH: loop header
LB: loop body
LE: loop exit
PB: predicated region body
PF: predicated region fallthrough
CT: control target
= control target key end

     0   :  { %8 = vsyncpa [#allocation3], 0  ;;  %s1512_s0 = inlined_call_operand.hbm [shape: bf16[2,256,128], index: 0, kind: input, shape index: {}, may-alias: {0,3}]   ;;  %s1513_s1 = inlined_call_operand.hbm [shape: f32[1,128], index: 1, kind: input, shape index: {}]   ;;  %s1514_s2 = inlined_call_operand.hbm [shape: f32[1,128], index: 2, kind: input, shape index: {}]   ;;  %s1515_s3 = inlined_call_operand.hbm [shape: bf16[2,256,128], index: 3, kind: output, shape index: {}, may-alias: {0,3}]  }
   0x1   :  { %10 = vsyncpa [#allocation3 + $0x1], 0 }
   0x2   :  { %11 = vsyncpa [#allocation6], 0 }
   0x3   :  { %12 = vsyncpa [#allocation4], 0 }
   0x4   :  { %14 = vsyncpa [#allocation4 + $0x1], 0  ;;  %s1171_s12 = smov 0   ;;  %s1173_s13 = smov 0  }
   0x5   :  { %s1175_s14 = smov 0   ;;  %s1177_s15 = smov 0  }
   0x6 LB: > { %s1192_s16 = sadd.s32 4294967295, %s1141_s15   ;;  %s654_s17 = sadd.s32 4294967294, %s1141_s15   ;;  %s1141_s15 = sphi %s1177_s15, %s1540_s15   ;;  %s1137_s14 = sphi %s1175_s14, %s1539_s14   ;;  %s1133_s13 = sphi %s1173_s13, %s1538_s13   ;;  %s1129_s12 = sphi %s1171_s12, %s1537_s12  }
   0x7   : > { %s1196_s18 = sadd.s32 1, %s1141_s15   ;;  %s27_s19 = sadd.s32 1, %s1137_s14 }
   0x8   : > { %s24_s20 = ssub.s32 %s1141_s15, %s1196_s18  ;;  %p34_p0 = scmp.ne.s32.totalorder %s1137_s14, %s1133_s13 }
   0x9   : > { %p25_p1 = scmp.eq.s32.totalorder %s24_s20, 0  ;;  %p35_p2 = scmp.eq.s32.totalorder %s1141_s15, 0 }
   0xa   : > { %p40_p3 = scmp.ne.s32.totalorder %s1133_s13, %s1129_s12  ;;  %p1516_p4 = scmp.eq.s32.totalorder %s1192_s16, 0 }
   0xb   : > { %s1208_s21 = scalar_select %p25_p1, %s1137_s14, %s27_s19  }
   0xc   : > { %p1210_p5 = por %p35_p2, %p34_p0  ;;  %p1216_p6 = por %p1516_p4, %p40_p3 }
   0xd   : > { %p106_p7 = scmp.eq.s32.totalorder %s1192_s16, 1  ;;  %p112_p8 = scmp.eq.s32.totalorder %s654_s17, 1 }
   0xe   : > { %s1522_s23 = scalar_select %p1216_p6, 1, 0 }
   0xf   : > { %p655_p9 = scmp.ge.s32.totalorder %s1141_s15, 1  ;;  %p119_p10 = scmp.lt.s32.totalorder %s1141_s15, 3 }
  0x10   : > { %p1223_p11 = por %p106_p7, %p34_p0  ;;  %p1227_p12 = por %p112_p8, %p40_p3 }
  0x11   : > { %p1231_p13 = pnand %p655_p9, %p119_p10  ;;  %s1143_s27 = smov [#allocation5]  }
  0x12   : > { %s1523_s24 = scalar_select %p1223_p11, 1, 0 }
  0x13   : > { %s1524_s25 = scalar_select %p1227_p12, 1, 0 }
  0x14   : > { %s1525_s26 = scalar_select %p1231_p13, 1, 0 }
  0x15   : > { %p926_p2 = pneg %p1231_p13  ;;  %s132_s28 = sshll.u32 %s1143_s27, 4  ;;  %s133_s28 = int_to_ptr.vmem [resolvable:$true] %s132_s28 }
  0x16   : > { %p943_p4 = scmp.lt.s32.totalorder %s1141_s15, 2  ;;  %p1526_p0 = scmp.eq.s32.totalorder %s1192_s16, 0 }
  0x17   : > { %s1144_s4 = smov [#allocation7]   ;;  %s985_s8 = scalar_lea.hbm %s1513_s1, 16 }
  0x18   : > { %p1241_p7 = pnand %p926_p2, %p1526_p0  ;;  %p1247_p3 = pnand %p943_p4, %p1210_p5 }
  0x19   : > { %s143_s5 = sshll.u32 %s1144_s4, 4  ;;  %p986_p8 = scmp.ne.s32.totalorder %s1513_s1, %s985_s8  ;;  %s1251_s5 = int_to_ptr.vmem [resolvable:$true] %s143_s5 }
  0x1a   : > { %s1528_s30 = scalar_select %p1247_p3, 1, 0 }
  0x1b   : > { %p987_p9 = pneg %p1241_p7  ;;  %p992_p10 = scmp.lt.u32.totalorder %s985_s8, %s1513_s1 }
  0x1d   : > { %p988_p4 = pnand %p987_p9, %p986_p8 }
  0x1f   : > { %p989_p5 = pneg %p988_p4 }
  0x21   : > { %p994_p2 = pnand %p992_p10, %p989_p5 }
  0x23   : > { %997 = shalt.err (!%p994_p2)
}
  0x24   : > { %s998_s19 = scalar_lea.vmem %s133_s28, 16  ;;  %s1005_s20 = scalar_lea.vmem %s133_s28, 32 }
  0x25   : > { %p999_p0 = scmp.ne.s32.totalorder %s133_s28, %s998_s19  ;;  %p1006_p11 = scmp.lt.s32.totalorder %s133_s28, %s133_s28 }
  0x26   : > { %p1007_p6 = scmp.lt.s32.totalorder %s1005_s20, %s998_s19 }
  0x27   : > { %p1001_p1 = pnand %p999_p0, %p987_p9 }
  0x28   : > { %p1008_p13 = por %p1007_p6, %p1006_p11 }
  0x29   : > { %p1002_p12 = pneg %p1001_p1 }
  0x2b   : > { %p1009_p3 = pnand %p1008_p13, %p1002_p12 }
  0x2d   : > { %1012 = shalt.err (!%p1009_p3)
}
  0x2e   : > { %929 = dma.hbm_to_vmem [thread:$0]  (!%p1241_p7), %s1513_s1, 16, %s133_s28, [#allocation6]  }
  0x2f   : > { %s154_s4 = sand.u32 1, %s1137_s14   ;;  %s1013_s8 = scalar_lea.hbm %s1514_s2, 16 }
  0x30   : > { %p1014_p1 = scmp.ne.s32.totalorder %s1514_s2, %s1013_s8  ;;  %p1020_p12 = scmp.lt.u32.totalorder %s1013_s8, %s1514_s2 }
  0x32   : > { %p1016_p6 = pnand %p1014_p1, %p987_p9 }
  0x34   : > { %p1017_p11 = pneg %p1016_p6 }
  0x36   : > { %p1022_p13 = pnand %p1020_p12, %p1017_p11 }
  0x38   : > { %1025 = shalt.err (!%p1022_p13)
}
  0x39   : > { %s1026_s28 = scalar_lea.vmem %s1251_s5, 16  ;;  %s1033_s19 = scalar_lea.vmem %s1251_s5, 32 }
  0x3a   : > { %p1027_p3 = scmp.ne.s32.totalorder %s1251_s5, %s1026_s28  ;;  %p1034_p5 = scmp.lt.s32.totalorder %s1251_s5, %s1251_s5 }
  0x3b   : > { %p1035_p10 = scmp.lt.s32.totalorder %s1033_s19, %s1026_s28 }
  0x3c   : > { %p1029_p8 = pnand %p1027_p3, %p987_p9 }
  0x3d   : > { %p1036_p2 = por %p1035_p10, %p1034_p5 }
  0x3e   : > { %p1030_p4 = pneg %p1029_p8 }
  0x40   : > { %p1037_p0 = pnand %p1036_p2, %p1030_p4 }
  0x42   : > { %1040 = shalt.err (!%p1037_p0)
}
  0x43   : > { %932 = dma.hbm_to_vmem [thread:$0]  (!%p1241_p7), %s1514_s2, 16, %s1251_s5, [#allocation6]  }
  0x44   : > { %s659_s27 = sshll.u32 %s154_s4, 7  ;;  %s706_s6 = sshll.u32 %s1141_s15, 11 }
  0x45   : > { %s1306_s9 = scalar_lea.hbm %s1512_s0, %s706_s6  ;;  %s158_s29 = scalar_lea.vmem [#allocation2], %s659_s27 }
  0x46   : > { %s165_s10 = sshll.u32 %s158_s29, 4  ;;  %s1310_s11 = scalar_lea.sflag [#allocation3], %s154_s4  ;;  %s1308_s10 = int_to_ptr.vmem [resolvable:$true] %s165_s10 }
  0x47   : > { %s1041_s17 = scalar_lea.hbm %s1306_s9, 2048  ;;  %p1529_p7 = scmp.ne.s32.totalorder %s1528_s30, 0 }
  0x48   : > { %p1042_p9 = scmp.ne.s32.totalorder %s1306_s9, %s1041_s17  ;;  %s1046_s19 = scalar_lea.hbm %s1512_s0, 4096 }
  0x49   : > { %p1043_p1 = pneg %p1529_p7  ;;  %p1047_p12 = scmp.lt.u32.totalorder %s1306_s9, %s1512_s0 }
  0x4a   : > { %p1048_p13 = scmp.lt.u32.totalorder %s1046_s19, %s1041_s17  ;;  %p1050_p8 = scmp.lt.u32.totalorder %s1041_s17, %s1306_s9 }
  0x4b   : > { %p1044_p6 = pnand %p1043_p1, %p1042_p9 }
  0x4c   : > { %p1049_p3 = por %p1048_p13, %p1047_p12 }
  0x4d   : > { %p1045_p11 = pneg %p1044_p6 }
  0x4e   : > { %p1051_p4 = por %p1050_p8, %p1049_p3 }
  0x50   : > { %p1052_p5 = pnand %p1051_p4, %p1045_p11 }
  0x52   : > { %1055 = shalt.err (!%p1052_p5)
}
  0x53   : > { %s1056_s4 = scalar_lea.vmem %s1308_s10, 2048  ;;  %s1145_s27 = smov [#allocation2]  }
  0x54   : > { %p1057_p10 = scmp.ne.s32.totalorder %s1308_s10, %s1056_s4  ;;  %s1061_s6 = sshll.u32 %s1145_s27, 4  ;;  %s1062_s6 = int_to_ptr.vmem [resolvable:$false] %s1061_s6 }
  0x55   : > { %s1063_s7 = scalar_lea.vmem %s1062_s6, 4096  ;;  %p1064_p9 = scmp.lt.s32.totalorder %s1308_s10, %s1062_s6 }
  0x56   : > { %p1059_p2 = pnand %p1057_p10, %p1043_p1  ;;  %p1065_p6 = scmp.lt.s32.totalorder %s1063_s7, %s1056_s4 }
  0x58   : > { %p1060_p0 = pneg %p1059_p2  ;;  %p1066_p12 = por %p1065_p6, %p1064_p9 }
  0x5a   : > { %p1067_p13 = pnand %p1066_p12, %p1060_p0 }
  0x5c   : > { %1070 = shalt.err (!%p1067_p13)
}
  0x5d   : > { %s1146_s8 = smov 64   ;;  %s1147_s29 = smov 4  }
  0x5e   : > { %936 = dma.hbm_to_vmem [thread:$0]  (!%p1529_p7), %s1306_s9, 2048, %s1308_s10, %s1310_s11, %s1146_s8, %s1146_s8, %s1147_s29  }
  0x5f   : > { %p1530_p1 = scmp.ne.s32.totalorder %s1525_s26, 0 }
  0x60   : > { %s1341_s17 = sand.u32 (!%p1530_p1), 1, %s1133_s13   ;;  %p1531_p11 = scmp.ne.s32.totalorder (!%p1530_p1), %s1522_s23, 0 }
  0x61   : > { %177 = sbr.rel (%p1530_p1) target bundleno = 165 (0xa5), region = 32  ;;  %s663_s5 = sshll.u32 (!%p1530_p1), %s1341_s17, 7 }
  0x62   : > { %s180_s28 = scalar_lea.sflag (!%p1530_p1), [#allocation3], %s1341_s17  ;;  %s1347_s19 = scalar_lea.vmem (!%p1530_p1), [#allocation2], %s663_s5 }
  0x68   : > { %1116 = dma.done.wait (%p1531_p11), %s180_s28, 2048  }
  0x69   : > { %1118 = vsyncadd (%p1531_p11), %s180_s28, 4294965248  ;;  %p1532_p7 = scmp.eq.s32.totalorder %s1192_s16, 0 }
  0x6b   : > { %1120 = dma.done.wait (%p1532_p7), [#allocation6], 32   ;;  %p1533_p3 = pmov %p1532_p7 }
  0x6c   : > { %v741_v0 = vld [vmem:[%s1347_s19] sm:$0xff]   ;;  %v884_v4 = vld [vmem:[%s1347_s19 + $0x8] sm:$0xff]   ;;  %v885_v5 = vld [vmem:[%s1347_s19 + $0x10] sm:$0xff]   ;;  %s1387_s23 = scalar_lea.vmem [#allocation8], %s663_s5  ;;  %s739_s26 = sshll.u32 %s1192_s16, 11 }
  0x6d   : > { %1122 = vsyncadd (%p1533_p3), [#allocation6], 4294967264  ;;  %v1358_v1 = vld [vmem:[#allocation5] ss:$0 sm:$0xff]  ;;  %v742_v2 = vunpack.c.l.bf16 %v741_v0  ;;  %v743_v3 = vunpack.c.h.bf16 %v741_v0  ;;  %v886_v6 = vld [vmem:[%s1347_s19 + $0x18] sm:$0xff]   ;;  %v746_v8 = vunpack.c.l.bf16 %v884_v4  ;;  %v747_v9 = vunpack.c.h.bf16 %v884_v4  ;;  %s562_s30 = sshll.u32 %s1387_s23, 4  ;;  %s1465_s11 = scalar_lea.hbm %s1515_s3, %s739_s26  ;;  %s1467_s30 = int_to_ptr.vmem [resolvable:$true] %s562_s30 }
  0x6e   : > { %v1363_v7 = vld [vmem:[#allocation7] ss:$0 sm:$0xff]  ;;  %v750_v10 = vunpack.c.l.bf16 %v885_v5  ;;  %v751_v11 = vunpack.c.h.bf16 %v885_v5  ;;  %v754_v14 = vunpack.c.l.bf16 %v886_v6  ;;  %v755_v15 = vunpack.c.h.bf16 %v886_v6  ;;  %v888_v33 = vld [vmem:[%s1347_s19 + $0x28] sm:$0xff]   ;;  %v889_v38 = vld [vmem:[%s1347_s19 + $0x30] sm:$0xff]   ;;  %s549_s20 = scalar_lea.sflag [#allocation4], %s1341_s17  ;;  %s1071_s22 = scalar_lea.vmem %s1467_s30, 2048 }
  0x6f   : > { %v285_v12 = vmul.f32 %v742_v2, %v1358_v1  ;;  %v286_v13 = vmul.f32 %v743_v3, %v1358_v1  ;;  %v287_v16 = vmul.f32 %v746_v8, %v1358_v1  ;;  %v288_v17 = vmul.f32 %v747_v9, %v1358_v1  ;;  %v887_v28 = vld [vmem:[%s1347_s19 + $0x20] sm:$0xff]   ;;  %v890_v43 = vld [vmem:[%s1347_s19 + $0x38] sm:$0xff]   ;;  %p1072_p8 = scmp.ne.s32.totalorder %s1467_s30, %s1071_s22  ;;  %p1534_p4 = scmp.ne.s32.totalorder %s1523_s24, 0 }
  0x70   : > { %v289_v18 = vmul.f32 %v750_v10, %v1358_v1  ;;  %v290_v19 = vmul.f32 %v751_v11, %v1358_v1  ;;  %v291_v22 = vmul.f32 %v754_v14, %v1358_v1  ;;  %v292_v23 = vmul.f32 %v755_v15, %v1358_v1  ;;  %v891_v0 = vld [vmem:[%s1347_s19 + $0x40] sm:$0xff]   ;;  %v892_v11 = vld [vmem:[%s1347_s19 + $0x48] sm:$0xff]   ;;  %s1148_s16 = smov [#allocation8]  }
  0x71   : > { %v324_v20 = vadd.f32 %v1363_v7, %v285_v12  ;;  %v325_v21 = vadd.f32 %v1363_v7, %v286_v13  ;;  %v326_v24 = vadd.f32 %v1363_v7, %v287_v16  ;;  %v327_v25 = vadd.f32 %v1363_v7, %v288_v17  ;;  %v893_v16 = vld [vmem:[%s1347_s19 + $0x50] sm:$0xff]   ;;  %p1073_p5 = pnand %p1072_p8, %p1534_p4  ;;  %s1075_s4 = sshll.u32 %s1148_s16, 4  ;;  %s1076_s4 = int_to_ptr.vmem [resolvable:$false] %s1075_s4 }
  0x72   : > { %v328_v26 = vadd.f32 %v1363_v7, %v289_v18  ;;  %v329_v27 = vadd.f32 %v1363_v7, %v290_v19  ;;  %v330_v31 = vadd.f32 %v1363_v7, %v291_v22  ;;  %v331_v32 = vadd.f32 %v1363_v7, %v292_v23  ;;  %s1077_s27 = scalar_lea.vmem %s1076_s4, 4096  ;;  %p1078_p2 = scmp.lt.s32.totalorder %s1467_s30, %s1076_s4 }
  0x73   : > { %v356_v29 = vmax.f32 %v324_v20, 0.0  ;;  %v357_v30 = vmax.f32 %v325_v21, 0.0  ;;  %v358_v34 = vmax.f32 %v326_v24, 0.0  ;;  %v359_v35 = vmax.f32 %v327_v25, 0.0  ;;  %v894_v25 = vld [vmem:[%s1347_s19 + $0x58] sm:$0xff]   ;;  %p1074_p10 = pneg %p1073_p5  ;;  %p1079_p0 = scmp.lt.s32.totalorder %s1077_s27, %s1071_s22 }
  0x74   : > { %v360_v36 = vmax.f32 %v328_v26, 0.0  ;;  %v361_v37 = vmax.f32 %v329_v27, 0.0  ;;  %v362_v40 = vmax.f32 %v330_v31, 0.0  ;;  %v363_v41 = vmax.f32 %v331_v32, 0.0 }
  0x75   : > { %v807_v39 = vpack.c.bf16 %v357_v30, %v356_v29  ;;  %v758_v42 = vunpack.c.l.bf16 %v887_v28  ;;  %v812_v44 = vpack.c.bf16 %v359_v35, %v358_v34  ;;  %v759_v46 = vunpack.c.h.bf16 %v887_v28  ;;  %p1080_p9 = por %p1079_p0, %p1078_p2 }
  0x76   : > { %v817_v45 = vpack.c.bf16 %v361_v37, %v360_v36  ;;  %v762_v47 = vunpack.c.l.bf16 %v888_v33  ;;  %v822_v48 = vpack.c.bf16 %v363_v41, %v362_v40  ;;  %v763_v50 = vunpack.c.h.bf16 %v888_v33 }
  0x77   : > { %808 = vst [vmem:[%s1387_s23] sm:$0xff] %v807_v39   ;;  %v293_v49 = vmul.f32 %v758_v42, %v1358_v1  ;;  %v766_v51 = vunpack.c.l.bf16 %v889_v38  ;;  %899 = vst [vmem:[%s1387_s23 + $0x8] sm:$0xff] %v812_v44   ;;  %v294_v52 = vmul.f32 %v759_v46, %v1358_v1  ;;  %v767_v54 = vunpack.c.h.bf16 %v889_v38  ;;  %v895_v38 = vld [vmem:[%s1347_s19 + $0x60] sm:$0xff]   ;;  %p1081_p6 = pnand %p1080_p9, %p1074_p10 }
  0x78   : > { %900 = vst [vmem:[%s1387_s23 + $0x10] sm:$0xff] %v817_v45   ;;  %v295_v53 = vmul.f32 %v762_v47, %v1358_v1  ;;  %v770_v55 = vunpack.c.l.bf16 %v890_v43  ;;  %901 = vst [vmem:[%s1387_s23 + $0x18] sm:$0xff] %v822_v48   ;;  %v296_v57 = vmul.f32 %v763_v50, %v1358_v1  ;;  %v771_v59 = vunpack.c.h.bf16 %v890_v43 }
  0x79   : > { %v332_v56 = vadd.f32 %v1363_v7, %v293_v49  ;;  %v297_v58 = vmul.f32 %v766_v51, %v1358_v1  ;;  %v333_v60 = vadd.f32 %v1363_v7, %v294_v52  ;;  %v298_v62 = vmul.f32 %v767_v54, %v1358_v1  ;;  %v896_v51 = vld [vmem:[%s1347_s19 + $0x68] sm:$0xff]  }
  0x7a   : > { %v334_v61 = vadd.f32 %v1363_v7, %v295_v53  ;;  %v299_v63 = vmul.f32 %v770_v55, %v1358_v1  ;;  %v335_v3 = vadd.f32 %v1363_v7, %v296_v57  ;;  %v300_v5 = vmul.f32 %v771_v59, %v1358_v1 }
  0x7b   : > { %v364_v2 = vmax.f32 %v332_v56, 0.0  ;;  %v336_v4 = vadd.f32 %v1363_v7, %v297_v58  ;;  %v365_v6 = vmax.f32 %v333_v60, 0.0  ;;  %v337_v9 = vadd.f32 %v1363_v7, %v298_v62  ;;  %v897_v60 = vld [vmem:[%s1347_s19 + $0x70] sm:$0xff]  }
  0x7c   : > { %v366_v8 = vmax.f32 %v334_v61, 0.0  ;;  %v338_v10 = vadd.f32 %v1363_v7, %v299_v63  ;;  %v367_v12 = vmax.f32 %v335_v3, 0.0  ;;  %v339_v14 = vadd.f32 %v1363_v7, %v300_v5 }
  0x7d   : > { %v368_v13 = vmax.f32 %v336_v4, 0.0  ;;  %v774_v15 = vunpack.c.l.bf16 %v891_v0  ;;  %v827_v17 = vpack.c.bf16 %v365_v6, %v364_v2  ;;  %v369_v18 = vmax.f32 %v337_v9, 0.0  ;;  %v898_v2 = vld [vmem:[%s1347_s19 + $0x78] sm:$0xff]  }
  0x7e   : > { %v370_v19 = vmax.f32 %v338_v10, 0.0  ;;  %v775_v20 = vunpack.c.h.bf16 %v891_v0  ;;  %v832_v21 = vpack.c.bf16 %v367_v12, %v366_v8  ;;  %v371_v22 = vmax.f32 %v339_v14, 0.0 }
  0x7f   : > { %v301_v23 = vmul.f32 %v774_v15, %v1358_v1  ;;  %v778_v24 = vunpack.c.l.bf16 %v892_v11  ;;  %902 = vst [vmem:[%s1387_s23 + $0x20] sm:$0xff] %v827_v17   ;;  %v837_v26 = vpack.c.bf16 %v369_v18, %v368_v13  ;;  %v779_v28 = vunpack.c.h.bf16 %v892_v11 }
  0x80   : > { %v302_v27 = vmul.f32 %v775_v20, %v1358_v1  ;;  %v782_v29 = vunpack.c.l.bf16 %v893_v16  ;;  %903 = vst [vmem:[%s1387_s23 + $0x28] sm:$0xff] %v832_v21   ;;  %v842_v30 = vpack.c.bf16 %v371_v22, %v370_v19  ;;  %v783_v33 = vunpack.c.h.bf16 %v893_v16 }
  0x81   : > { %v340_v31 = vadd.f32 %v1363_v7, %v301_v23  ;;  %v303_v32 = vmul.f32 %v778_v24, %v1358_v1  ;;  %904 = vst [vmem:[%s1387_s23 + $0x30] sm:$0xff] %v837_v26   ;;  %v304_v35 = vmul.f32 %v779_v28, %v1358_v1  ;;  %v786_v37 = vunpack.c.l.bf16 %v894_v25 }
  0x82   : > { %v341_v34 = vadd.f32 %v1363_v7, %v302_v27  ;;  %v305_v36 = vmul.f32 %v782_v29, %v1358_v1  ;;  %905 = vst [vmem:[%s1387_s23 + $0x38] sm:$0xff] %v842_v30   ;;  %v306_v41 = vmul.f32 %v783_v33, %v1358_v1  ;;  %v787_v42 = vunpack.c.h.bf16 %v894_v25 }
  0x83   : > { %v372_v39 = vmax.f32 %v340_v31, 0.0  ;;  %v342_v40 = vadd.f32 %v1363_v7, %v303_v32  ;;  %v343_v44 = vadd.f32 %v1363_v7, %v304_v35  ;;  %v307_v46 = vmul.f32 %v786_v37, %v1358_v1 }
  0x84   : > { %v373_v43 = vmax.f32 %v341_v34, 0.0  ;;  %v344_v45 = vadd.f32 %v1363_v7, %v305_v36  ;;  %v345_v48 = vadd.f32 %v1363_v7, %v306_v41  ;;  %v308_v49 = vmul.f32 %v787_v42, %v1358_v1 }
  0x85   : > { %v374_v47 = vmax.f32 %v342_v40, 0.0  ;;  %v790_v50 = vunpack.c.l.bf16 %v895_v38  ;;  %v375_v53 = vmax.f32 %v343_v44, 0.0  ;;  %v346_v55 = vadd.f32 %v1363_v7, %v307_v46 }
  0x86   : > { %v847_v52 = vpack.c.bf16 %v373_v43, %v372_v39  ;;  %v376_v54 = vmax.f32 %v344_v45, 0.0  ;;  %v377_v56 = vmax.f32 %v345_v48, 0.0  ;;  %v347_v57 = vadd.f32 %v1363_v7, %v308_v49 }
  0x87   : > { %v791_v58 = vunpack.c.h.bf16 %v895_v38  ;;  %v309_v59 = vmul.f32 %v790_v50, %v1358_v1  ;;  %v852_v61 = vpack.c.bf16 %v375_v53, %v374_v47  ;;  %v378_v62 = vmax.f32 %v346_v55, 0.0 }
  0x88   : > { %906 = vst [vmem:[%s1387_s23 + $0x40] sm:$0xff] %v847_v52   ;;  %v794_v63 = vunpack.c.l.bf16 %v896_v51  ;;  %v795_v0 = vunpack.c.h.bf16 %v896_v51  ;;  %v857_v3 = vpack.c.bf16 %v377_v56, %v376_v54  ;;  %v379_v4 = vmax.f32 %v347_v57, 0.0 }
  0x89   : > { %v310_v5 = vmul.f32 %v791_v58, %v1358_v1  ;;  %v348_v6 = vadd.f32 %v1363_v7, %v309_v59  ;;  %907 = vst [vmem:[%s1387_s23 + $0x48] sm:$0xff] %v852_v61   ;;  %v798_v10 = vunpack.c.l.bf16 %v897_v60  ;;  %v799_v11 = vunpack.c.h.bf16 %v897_v60 }
  0x8a   : > { %v311_v8 = vmul.f32 %v794_v63, %v1358_v1  ;;  %v312_v9 = vmul.f32 %v795_v0, %v1358_v1  ;;  %908 = vst [vmem:[%s1387_s23 + $0x50] sm:$0xff] %v857_v3   ;;  %v862_v12 = vpack.c.bf16 %v379_v4, %v378_v62  ;;  %v802_v15 = vunpack.c.l.bf16 %v898_v2 }
  0x8b   : > { %v349_v13 = vadd.f32 %v1363_v7, %v310_v5  ;;  %v380_v14 = vmax.f32 %v348_v6, 0.0  ;;  %v313_v18 = vmul.f32 %v798_v10, %v1358_v1  ;;  %v314_v19 = vmul.f32 %v799_v11, %v1358_v1 }
  0x8c   : > { %v350_v16 = vadd.f32 %v1363_v7, %v311_v8  ;;  %v351_v17 = vadd.f32 %v1363_v7, %v312_v9  ;;  %909 = vst [vmem:[%s1387_s23 + $0x58] sm:$0xff] %v862_v12   ;;  %v803_v21 = vunpack.c.h.bf16 %v898_v2  ;;  %v315_v22 = vmul.f32 %v802_v15, %v1358_v1 }
  0x8d   : > { %v381_v20 = vmax.f32 %v349_v13, 0.0  ;;  %v352_v25 = vadd.f32 %v1363_v7, %v313_v18  ;;  %v353_v26 = vadd.f32 %v1363_v7, %v314_v19 }
  0x8e   : > { %v382_v23 = vmax.f32 %v350_v16, 0.0  ;;  %v383_v24 = vmax.f32 %v351_v17, 0.0  ;;  %v316_v28 = vmul.f32 %v803_v21, %v1358_v1  ;;  %v354_v29 = vadd.f32 %v1363_v7, %v315_v22 }
  0x8f   : > { %v867_v27 = vpack.c.bf16 %v381_v20, %v380_v14  ;;  %v384_v31 = vmax.f32 %v352_v25, 0.0  ;;  %v385_v32 = vmax.f32 %v353_v26, 0.0 }
  0x90   : > { %v872_v30 = vpack.c.bf16 %v383_v24, %v382_v23  ;;  %v355_v33 = vadd.f32 %v1363_v7, %v316_v28  ;;  %v386_v34 = vmax.f32 %v354_v29, 0.0 }
  0x91   : > { %910 = vst [vmem:[%s1387_s23 + $0x60] sm:$0xff] %v867_v27   ;;  %v877_v35 = vpack.c.bf16 %v385_v32, %v384_v31 }
  0x92   : > { %911 = vst [vmem:[%s1387_s23 + $0x68] sm:$0xff] %v872_v30   ;;  %v387_v36 = vmax.f32 %v355_v33, 0.0 }
  0x93   : > { %912 = vst [vmem:[%s1387_s23 + $0x70] sm:$0xff] %v877_v35  }
  0x94   : > { %v882_v1 = vpack.c.bf16 %v387_v36, %v386_v34 }
  0x96   : > { %913 = vst [vmem:[%s1387_s23 + $0x78] sm:$0xff] %v882_v1  }
  0x97   : > { %1084 = shalt.err (!%p1081_p6)
}
  0x98   : > { %s1085_s6 = scalar_lea.hbm %s1465_s11, 2048  ;;  %s1089_s29 = scalar_lea.hbm %s1515_s3, 4096 }
  0x99   : > { %p1086_p12 = scmp.ne.s32.totalorder %s1465_s11, %s1085_s6  ;;  %p1090_p11 = scmp.lt.u32.totalorder %s1465_s11, %s1515_s3 }
  0x9a   : > { %p1091_p7 = scmp.lt.u32.totalorder %s1089_s29, %s1085_s6  ;;  %p1093_p8 = scmp.lt.u32.totalorder %s1085_s6, %s1465_s11 }
  0x9b   : > { %p1087_p13 = pnand %p1086_p12, %p1534_p4 }
  0x9c   : > { %p1092_p3 = por %p1091_p7, %p1090_p11 }
  0x9d   : > { %p1088_p1 = pneg %p1087_p13 }
  0x9e   : > { %p1094_p5 = por %p1093_p8, %p1092_p3 }
  0xa0   : > { %p1095_p10 = pnand %p1094_p5, %p1088_p1 }
  0xa2   : > { %1098 = shalt.err (!%p1095_p10)
}
  0xa3   : > { %s1149_s19 = smov 64   ;;  %s1150_s23 = smov 4  }
  0xa4   : > { %924 = dma.vmem_to_hbm [thread:$0]  (%p1534_p4), %s1467_s30, 2048, %s1465_s11, %s549_s20, %s1149_s19, %s1149_s19, %s1150_s23  }
  0xa5 PF: > { %s577_s26 = sand.u32 1, %s1129_s12   ;;  %p1535_p2 = scmp.ne.s32.totalorder %s1524_s25, 0 }
  0xa6   : > { %p1536_p0 = scmp.ge.s32.totalorder %s1141_s15, 2  ;;  %s578_s9 = scalar_lea.sflag [#allocation4], %s577_s26 }
  0xa8   : > { %p938_p9 = pnand %p1536_p0, %p1535_p2 }
  0xaa   : > { %1124 = dma.done.wait (!%p938_p9), %s578_s9, 2048  }
  0xab   : > { %1126 = vsyncadd (!%p938_p9), %s578_s9, 4294965248  ;;  %p17_p6 = scmp.ge.s32.totalorder %s1196_s18, 4   ;;  %s1537_s12 = smov %s1133_s13 }
  0xac   : > { %s1538_s13 = smov %s1137_s14  ;;  %s1539_s14 = smov %s1208_s21 }
  0xad   : > { %s1540_s15 = smov %s1196_s18  ;;  %19 = sbr.rel (!%p17_p6) target bundleno = 6 (0x6), region = 85 }
  0xb4   :  { %583 = vsyncpa [#allocation3], 1 }
  0xb5   :  { %585 = vsyncpa [#allocation3 + $0x1], 1 }
  0xb6   :  { %586 = vsyncpa [#allocation6], 1 }
  0xb7   :  { %587 = vsyncpa [#allocation4], 1 }
  0xb8   :  { %589 = vsyncpa [#allocation4 + $0x1], 1 }

// kernel: up_conv_forward.2
= control target key start
LH: loop header
LB: loop body
LE: loop exit
PB: predicated region body
PF: predicated region fallthrough
CT: control target
= control target key end

     0   :  { %9 = vsyncpa [#allocation3], 0  ;;  %s4724_s0 = inlined_call_operand.hbm [shape: bf16[2,8,8,4], index: 0, kind: input, shape index: {}]   ;;  %s4725_s1 = inlined_call_operand.hbm [shape: bf16[3,12,128], index: 1, kind: input, shape index: {}]   ;;  %s4726_s2 = inlined_call_operand.hbm [shape: bf16[2,256,128], index: 2, kind: output, shape index: {0}]   ;;  %s4727_s3 = inlined_call_operand.hbm [shape: f32[2,2,128], index: 3, kind: output, shape index: {1}]  }
   0x1   :  { %11 = vsyncpa [#allocation3 + $0x1], 0 }
   0x2   :  { %12 = vsyncpa [#allocation6], 0 }
   0x3   :  { %13 = vsyncpa [#allocation4], 0 }
   0x4   :  { %15 = vsyncpa [#allocation4 + $0x1], 0 }
   0x5   :  { %16 = vsyncpa [#allocation9], 0 }
   0x6   :  { %18 = vsyncpa [#allocation9 + $0x1], 0  ;;  %s3818_s12 = smov 0   ;;  %s3820_s13 = smov 0  }
   0x7   :  { %s3822_s14 = smov 0   ;;  %s3824_s15 = smov 0  }
   0x8 LB: > { %s3839_s16 = sadd.s32 4294967295, %s3785_s15   ;;  %s3059_s17 = sadd.s32 4294967294, %s3785_s15   ;;  %s3785_s15 = sphi %s3824_s15, %s4749_s15   ;;  %s3781_s14 = sphi %s3822_s14, %s4748_s14   ;;  %s3777_s13 = sphi %s3820_s13, %s4747_s13   ;;  %s3773_s12 = sphi %s3818_s12, %s4746_s12  }
   0x9   : > { %p44_p0 = scmp.ne.s32.totalorder %s3777_s13, %s3773_s12  ;;  %p4728_p1 = scmp.eq.s32.totalorder %s3839_s16, 0 }
   0xa   : > { %p95_p3 = scmp.eq.s32.totalorder %s3059_s17, 1  ;;  %p3060_p5 = scmp.ge.s32.totalorder %s3785_s15, 1 }
   0xb   : > { %p3848_p4 = por %p4728_p1, %p44_p0  ;;  %p128_p7 = scmp.lt.s32.totalorder %s3785_s15, 3 }
   0xc   : > { %p3853_p6 = por %p95_p3, %p44_p0  ;;  %s3787_s21 = smov [#allocation5]  }
   0xd   : > { %s4731_s18 = scalar_select %p3848_p4, 1, 0 }
   0xe   : > { %s4732_s19 = scalar_select %p3853_p6, 1, 0 }
   0xf   : > { %p3858_p8 = pnand %p3060_p5, %p128_p7  ;;  %s140_s22 = sshll.u32 %s3787_s21, 4  ;;  %s3862_s22 = int_to_ptr.vmem [resolvable:$true] %s140_s22 }
  0x10   : > { %s3874_s24 = sadd.s32 1, %s3785_s15   ;;  %s31_s25 = sadd.s32 1, %s3781_s14 }
  0x11   : > { %s4733_s20 = scalar_select %p3858_p8, 1, 0 }
  0x12   : > { %p3563_p9 = pneg %p3858_p8  ;;  %s28_s26 = ssub.s32 %s3785_s15, %s3874_s24 }
  0x13   : > { %s3625_s29 = scalar_lea.hbm %s4725_s1, 384 }
  0x14   : > { %p3869_p11 = pnand %p3563_p9, %p4728_p1  ;;  %p3626_p12 = scmp.ne.s32.totalorder %s4725_s1, %s3625_s29 }
  0x15   : > { %p3632_p5 = scmp.lt.u32.totalorder %s3625_s29, %s4725_s1 }
  0x16   : > { %p3627_p13 = pneg %p3869_p11 }
  0x18   : > { %p3628_p0 = pnand %p3627_p13, %p3626_p12 }
  0x1a   : > { %p3629_p3 = pneg %p3628_p0 }
  0x1c   : > { %p3634_p7 = pnand %p3632_p5, %p3629_p3 }
  0x1e   : > { %3637 = shalt.err (!%p3634_p7)
}
  0x1f   : > { %s3638_s7 = scalar_lea.vmem %s3862_s22, 384  ;;  %p3646_p2 = scmp.lt.s32.totalorder %s3862_s22, %s3862_s22 }
  0x20   : > { %p3639_p9 = scmp.ne.s32.totalorder %s3862_s22, %s3638_s7  ;;  %p3647_p6 = scmp.lt.s32.totalorder %s3638_s7, %s3638_s7 }
  0x22   : > { %p3641_p10 = pnand %p3639_p9, %p3627_p13  ;;  %p3648_p4 = por %p3647_p6, %p3646_p2 }
  0x24   : > { %p3642_p1 = pneg %p3641_p10 }
  0x26   : > { %p3649_p8 = pnand %p3648_p4, %p3642_p1 }
  0x28   : > { %3652 = shalt.err (!%p3649_p8)
}
  0x29   : > { %s3788_s8 = smov 64   ;;  %s3789_s9 = smov 4  }
  0x2a   : > { %3566 = dma.hbm_to_vmem [thread:$0]  (!%p3869_p11), %s4725_s1, 384, %s3862_s22, [#allocation6], %s3788_s8, %s3788_s8, %s3789_s9  }
  0x2b   : > { %p29_p1 = scmp.eq.s32.totalorder %s28_s26, 0  ;;  %p38_p2 = scmp.ne.s32.totalorder %s3781_s14, %s3777_s13 }
  0x2c   : > { %p39_p4 = scmp.eq.s32.totalorder %s3785_s15, 0  ;;  %p3579_p6 = scmp.lt.s32.totalorder %s3785_s15, 2 }
  0x2d   : > { %s3908_s17 = scalar_select %p29_p1, %s3781_s14, %s31_s25  }
  0x2e   : > { %p40_p8 = por %p39_p4, %p38_p2  ;;  %p4735_p10 = scmp.eq.s32.totalorder %s3839_s16, 1 }
  0x2f   : > { %s154_s23 = sand.u32 1, %s3781_s14   ;;  %s3201_s27 = sshll.u32 %s3785_s15, 9 }
  0x30   : > { %p3912_p12 = por %p4735_p10, %p38_p2  ;;  %s3063_s28 = sshll.u32 %s154_s23, 5 }
  0x31   : > { %s3921_s4 = scalar_lea.hbm %s4724_s0, %s3201_s27  ;;  %s158_s22 = scalar_lea.vmem [#allocation2], %s3063_s28 }
  0x32   : > { %s165_s25 = sshll.u32 %s158_s22, 4  ;;  %p3923_p11 = pnand %p3579_p6, %p40_p8  ;;  %s3927_s25 = int_to_ptr.vmem [resolvable:$true] %s165_s25 }
  0x33   : > { %s3929_s5 = scalar_lea.sflag [#allocation3], %s154_s23  ;;  %s3653_s6 = scalar_lea.hbm %s3921_s4, 512 }
  0x34   : > { %p3654_p13 = scmp.ne.s32.totalorder %s3921_s4, %s3653_s6  ;;  %p3655_p0 = pneg %p3923_p11 }
  0x35   : > { %s3658_s11 = scalar_lea.hbm %s4724_s0, 1024  ;;  %p3659_p7 = scmp.lt.u32.totalorder %s3921_s4, %s4724_s0 }
  0x36   : > { %p3656_p3 = pnand %p3655_p0, %p3654_p13  ;;  %p3660_p9 = scmp.lt.u32.totalorder %s3658_s11, %s3653_s6 }
  0x37   : > { %p3662_p2 = scmp.lt.u32.totalorder %s3653_s6, %s3921_s4 }
  0x38   : > { %p3657_p5 = pneg %p3656_p3  ;;  %p3661_p1 = por %p3660_p9, %p3659_p7 }
  0x3a   : > { %p3663_p4 = por %p3662_p2, %p3661_p1 }
  0x3c   : > { %p3664_p6 = pnand %p3663_p4, %p3657_p5 }
  0x3e   : > { %3667 = shalt.err (!%p3664_p6)
}
  0x3f   : > { %s3668_s23 = scalar_lea.vmem %s3927_s25, 512  ;;  %s3790_s29 = smov [#allocation2]  }
  0x40   : > { %p3669_p8 = scmp.ne.s32.totalorder %s3927_s25, %s3668_s23  ;;  %s3673_s30 = sshll.u32 %s3790_s29, 4  ;;  %s3674_s30 = int_to_ptr.vmem [resolvable:$false] %s3673_s30 }
  0x41   : > { %s3675_s22 = scalar_lea.vmem %s3674_s30, 1024  ;;  %p3676_p3 = scmp.lt.s32.totalorder %s3927_s25, %s3674_s30 }
  0x42   : > { %p3671_p10 = pnand %p3669_p8, %p3655_p0  ;;  %p3677_p7 = scmp.lt.s32.totalorder %s3675_s22, %s3668_s23 }
  0x44   : > { %p3672_p13 = pneg %p3671_p10  ;;  %p3678_p9 = por %p3677_p7, %p3676_p3 }
  0x46   : > { %p3679_p1 = pnand %p3678_p9, %p3672_p13 }
  0x48   : > { %3682 = shalt.err (!%p3679_p1)
}
  0x49   : > { %3570 = dma.hbm_to_vmem [thread:$0]  (!%p3923_p11), %s3921_s4, 512, %s3927_s25, %s3929_s5, %s3788_s8, %s3788_s8, %s3789_s9  }
  0x4a   : > { %p4738_p0 = scmp.ne.s32.totalorder %s4733_s20, 0 }
  0x4b   : > { %s3963_s6 = sand.u32 (!%p4738_p0), 1, %s3777_s13   ;;  %p4739_p5 = scmp.ne.s32.totalorder (!%p4738_p0), %s4731_s18, 0 }
  0x4c   : > { %177 = sbr.rel (%p4738_p0) target bundleno = 744 (0x2e8), region = 28  ;;  %s3067_s7 = sshll.u32 (!%p4738_p0), %s3963_s6, 5 }
  0x4d   : > { %s180_s10 = scalar_lea.sflag (!%p4738_p0), [#allocation3], %s3963_s6  ;;  %s3967_s11 = scalar_lea.vmem (!%p4738_p0), [#allocation2], %s3067_s7 }
  0x53   : > { %3756 = dma.done.wait (%p4739_p5), %s180_s10, 512  }
  0x54   : > { %3758 = vsyncadd (%p4739_p5), %s180_s10, 4294966784  ;;  %p4740_p11 = scmp.eq.s32.totalorder %s3839_s16, 0 }
  0x56   : > { %3760 = dma.done.wait (%p4740_p11), [#allocation6], 384   ;;  %p4741_p2 = pmov %p4740_p11 }
  0x57   : > { %vm1793_vm0 = vcmask 1040384   ;;  %vm1794_vm1 = vsmask.f32 256  ;;  %v243_v0 = vlaneseq  ;;  %v3791_v1 = vmov 0   ;;  %s3793_s18 = smov 8   ;;  %s3794_s20 = smov 4  }
  0x58   : > { %3762 = vsyncadd (%p4741_p2), [#allocation6], 4294966912  ;;  %v1715_v2 = vrot.slane %v3791_v1, 7  ;;  %vm1959_vm3 = vcmask 1046528   ;;  %v3792_v6 = vmov 1966171168  }
  0x59   : > { %vm3978_vm2 = vmand %vm1793_vm0, %vm1794_vm1  ;;  %v241_v7 = vunpack.c.l.s4 %v3792_v6  ;;  %v244_v8 = vshrl.u32 %v243_v0, 7  ;;  %vm1814_vm4 = vsmask.f32 7424  ;;  %vm2005_vm5 = vcmask 31744   ;;  %s3069_s8 = sshll.u32 %s3963_s6, 7  ;;  %s3234_s4 = sshll.u32 %s3839_s16, 11 }
  0x5a   : > { %v3984_v4 = vsel %vm3978_vm2, 0, %v1715_v2  ;;  %v1805_v5 = vsel %vm3978_vm2, %v1715_v2, 0  ;;  %v3071_v19 = vld.sshfl [vmem:[%s3967_s11] sm:$0x33 pattern:$0x75316420]  ;;  %s4568_s27 = scalar_lea.hbm %s4726_s2, %s3234_s4 }
  0x5b   : > { %v1816_v9 = vshrl.u32 %v3984_v4, 16  ;;  %v1818_v10 = vshll.u32 %v3984_v4, 16  ;;  %v1823_v11 = vshll.u32 %v1805_v5, 16  ;;  %v1960_v12 = vrot.slane %v3984_v4, 1  ;;  %s4436_s9 = scalar_lea.vmem [#allocation7], %s3069_s8  ;;  %s2913_s28 = scalar_lea.sflag [#allocation4], %s3963_s6 }
  0x5c   : > { %v1961_v13 = vrot.slane %v1805_v5, 1  ;;  %v242_v14 = vunpack.c.0.s8 %v241_v7  ;;  %v3991_v17 = vsub.s32 0, %v244_v8  ;;  %v239_v22 = vcombine.high %v3071_v19, %v3071_v19  ;;  %v3072_v23 = vld.sshfl [vmem:[%s3967_s11 + $0x4] sm:$0x33 pattern:$0x75316420] }
  0x5d   : > { %v1820_v15 = vrot.slane %v1818_v10, 1  ;;  %v1825_v16 = vrot.slane %v1823_v11, 1  ;;  %v263_v25 = vcombine.high %v3072_v23, %v3072_v23  ;;  %v4004_v27 = vld.sshfl [vmem:[%s3967_s11 + $0x8] sm:$0x33 pattern:$0x75316420] }
  0x5e   : > { %v1962_v18 = vsel %vm1959_vm3, %v1960_v12, %v1961_v13  ;;  %v3995_v20 = vsub.s32 %v242_v14, %v244_v8  ;;  %v287_v30 = vcombine.high %v4004_v27, %v4004_v27  ;;  %vm2070_vm6 = vcmask 1045504   ;;  %s2931_s25 = sshll.u32 %s4436_s9, 4  ;;  %s3795_s29 = smov [#allocation7]   ;;  %s4573_s25 = int_to_ptr.vmem [resolvable:$true] %s2931_s25 }
  0x5f   : > { %v1821_v21 = vor.u32 %v1820_v15, %v1816_v9  ;;  %1987 = vrot.lane.b32.xlu1 %v1962_v18, %s3793_s18  ;;  %vm2024_vm7 = vcmask 64512   ;;  %vm2053_vm8 = vcmask 97280   ;;  %s3683_s23 = scalar_lea.vmem %s4573_s25, 2048  ;;  %s3687_s30 = sshll.u32 %s3795_s29, 4  ;;  %s3688_s30 = int_to_ptr.vmem [resolvable:$false] %s3687_s30 }
  0x60   : > { %v246_v24 = vrot.slane %v3071_v19, %v3995_v20  ;;  %v4001_v26 = vrot.slane %v3072_v23, %v3995_v20  ;;  %v253_v29 = vrot.slane %v239_v22, %v3995_v20  ;;  %v4012_v31 = vrot.slane %v4004_v27, %v3995_v20  ;;  %p3684_p4 = scmp.ne.s32.totalorder %s4573_s25, %s3683_s23  ;;  %s3689_s22 = scalar_lea.vmem %s3688_s30, 4096 }
  0x61   : > { %v1826_v28 = vsel %vm1814_vm4, %v1821_v21, %v1825_v16  ;;  %v277_v35 = vrot.slane %v263_v25, %v3995_v20  ;;  %p3690_p10 = scmp.lt.s32.totalorder %s4573_s25, %s3688_s30  ;;  %p3691_p13 = scmp.lt.s32.totalorder %s3689_s22, %s3683_s23 }
  0x62   : > { %1923 = vrot.lane.b32.xlu0 %v1826_v28, %s3794_s20  ;;  %v254_v32 = vcombine.high %v246_v24, %v246_v24  ;;  %v425_v33 = vunpack.i.h.s16 %v246_v24  ;;  %v3079_v34 = vpack.i.b16 %v246_v24, %v246_v24  ;;  %v255_v36 = vcombine.high %v253_v29, %v253_v29  ;;  %p3685_p6 = pnand %p3684_p4, %p3912_p12 }
  0x63   : > { %v427_v37 = vunpack.i.h.s16 %v253_v29  ;;  %v3080_v38 = vpack.i.b16 %v253_v29, %v253_v29  ;;  %v278_v39 = vcombine.high %v4001_v26, %v4001_v26  ;;  %v279_v5 = vcombine.high %v277_v35, %v277_v35  ;;  %p3692_p3 = por %p3691_p13, %p3690_p10 }
  0x64   : > { %v429_v40 = vunpack.i.h.s16 %v254_v32  ;;  %v489_v41 = vpack.i.b16 %v425_v33, %v425_v33  ;;  %v3081_v42 = vpack.i.b16 %v254_v32, %v254_v32  ;;  %v555_v43 = vrot.slane %v3079_v34, %v3991_v17  ;;  %p3686_p8 = pneg %p3685_p6 }
  0x65   : > { %v431_v44 = vunpack.i.h.s16 %v255_v36  ;;  %v491_v45 = vpack.i.b16 %v427_v37, %v427_v37  ;;  %v3082_v46 = vpack.i.b16 %v255_v36, %v255_v36  ;;  %v563_v47 = vrot.slane %v3080_v38, %v3991_v17 }
  0x66   : > { %v493_v48 = vpack.i.b16 %v429_v40, %v429_v40  ;;  %v559_v49 = vrot.slane %v489_v41, %v3991_v17  ;;  %v571_v50 = vrot.slane %v3081_v42, %v3991_v17  ;;  %v809_v51 = vpack.i.b16 %v555_v43, %v555_v43  ;;  %p3693_p7 = pnand %p3692_p3, %p3686_p8 }
  0x67   : > { %v495_v52 = vpack.i.b16 %v431_v44, %v431_v44  ;;  %v567_v53 = vrot.slane %v491_v45, %v3991_v17  ;;  %v579_v54 = vrot.slane %v3082_v46, %v3991_v17  ;;  %v823_v55 = vpack.i.b16 %v563_v47, %v563_v47 }
  0x68   : > { %v575_v56 = vrot.slane %v493_v48, %v3991_v17  ;;  %v814_v57 = vrot.slane %v809_v51, %v3991_v17  ;;  %v816_v58 = vpack.i.b16 %v559_v49, %v559_v49  ;;  %v837_v59 = vpack.i.b16 %v571_v50, %v571_v50 }
  0x69   : > { %v583_v60 = vrot.slane %v495_v52, %v3991_v17  ;;  %v828_v61 = vrot.slane %v823_v55, %v3991_v17  ;;  %v830_v62 = vpack.i.b16 %v567_v53, %v567_v53  ;;  %v851_v63 = vpack.i.b16 %v579_v54, %v579_v54 }
  0x6a   : > { %v821_v0 = vrot.slane %v816_v58, %v3991_v17  ;;  %v842_v1 = vrot.slane %v837_v59, %v3991_v17  ;;  %v844_v2 = vpack.i.b16 %v575_v56, %v575_v56  ;;  %v433_v9 = vunpack.i.h.s16 %v4001_v26 }
  0x6b   : > { %v835_v6 = vrot.slane %v830_v62, %v3991_v17  ;;  %v856_v7 = vrot.slane %v851_v63, %v3991_v17  ;;  %v858_v8 = vpack.i.b16 %v583_v60, %v583_v60  ;;  %v435_v12 = vunpack.i.h.s16 %v277_v35 }
  0x6c   : > { %v849_v10 = vrot.slane %v844_v2, %v3991_v17  ;;  %v1320_v11 = vcombine.low %v814_v57, %v821_v0  ;;  %v437_v13 = vunpack.i.h.s16 %v278_v39  ;;  %v439_v16 = vunpack.i.h.s16 %v279_v5 }
  0x6d   : > { %v863_v14 = vrot.slane %v858_v8, %v3991_v17  ;;  %v1321_v15 = vcombine.low %v828_v61, %v835_v6  ;;  %v3083_v18 = vpack.i.b16 %v4001_v26, %v4001_v26  ;;  %v497_v22 = vpack.i.b16 %v433_v9, %v433_v9 }
  0x6e   : > { %v1322_v19 = vcombine.low %v842_v1, %v849_v10  ;;  %v1330_v21 = vrot.slane %v1320_v11, %v3995_v20  ;;  %v3084_v23 = vpack.i.b16 %v277_v35, %v277_v35  ;;  %v499_v28 = vpack.i.b16 %v435_v12, %v435_v12 }
  0x6f   : > { %v1323_v24 = vcombine.low %v856_v7, %v863_v14  ;;  %v1337_v25 = vrot.slane %v1321_v15, %v3995_v20  ;;  %v3085_v29 = vpack.i.b16 %v278_v39, %v278_v39  ;;  %v501_v33 = vpack.i.b16 %v437_v13, %v437_v13 }
  0x70   : > { %v1344_v32 = vrot.slane %v1322_v19, %v3995_v20  ;;  %v3086_v34 = vpack.i.b16 %v279_v5, %v279_v5  ;;  %v503_v36 = vpack.i.b16 %v439_v16, %v439_v16  ;;  %v587_v26 = vrot.slane %v3083_v18, %v3991_v17 }
  0x71   : > { %v1351_v37 = vrot.slane %v1323_v24, %v3995_v20  ;;  %v1352_v38 = vcombine.low %v1330_v21, %v1337_v25  ;;  %v591_v40 = vrot.slane %v497_v22, %v3991_v17  ;;  %v595_v41 = vrot.slane %v3084_v23, %v3991_v17 }
  0x72   : > { %v599_v35 = vrot.slane %v499_v28, %v3991_v17  ;;  %v603_v42 = vrot.slane %v3085_v29, %v3991_v17  ;;  %v607_v39 = vrot.slane %v501_v33, %v3991_v17  ;;  %v611_v45 = vrot.slane %v3086_v34, %v3991_v17 }
  0x73   : > { %v1353_v43 = vcombine.low %v1344_v32, %v1351_v37  ;;  %v1360_v44 = vrot.slane %v1352_v38, %v3995_v20  ;;  %v615_v46 = vrot.slane %v503_v36, %v3991_v17  ;;  %v865_v47 = vpack.i.b16 %v587_v26, %v587_v26 }
  0x74   : > { %v872_v48 = vpack.i.b16 %v591_v40, %v591_v40  ;;  %v879_v49 = vpack.i.b16 %v595_v41, %v595_v41  ;;  %v886_v50 = vpack.i.b16 %v599_v35, %v599_v35  ;;  %v893_v52 = vpack.i.b16 %v603_v42, %v603_v42 }
  0x75   : > { %v1367_v51 = vrot.slane %v1353_v43, %v3995_v20  ;;  %v900_v53 = vpack.i.b16 %v607_v39, %v607_v39  ;;  %v907_v54 = vpack.i.b16 %v611_v45, %v611_v45  ;;  %v870_v55 = vrot.slane %v865_v47, %v3991_v17 }
  0x76   : > { %v877_v56 = vrot.slane %v872_v48, %v3991_v17  ;;  %v884_v57 = vrot.slane %v879_v49, %v3991_v17  ;;  %v891_v58 = vrot.slane %v886_v50, %v3991_v17  ;;  %v898_v60 = vrot.slane %v893_v52, %v3991_v17 }
  0x77   : > { %v1368_v59 = vcombine.low %v1360_v44, %v1367_v51  ;;  %v905_v61 = vrot.slane %v900_v53, %v3991_v17  ;;  %v912_v62 = vrot.slane %v907_v54, %v3991_v17  ;;  %v914_v63 = vpack.i.b16 %v615_v46, %v615_v46 }
  0x78   : > { %v1369_v0 = vcombine.low %v870_v55, %v877_v56  ;;  %v1370_v1 = vcombine.low %v884_v57, %v891_v58  ;;  %v301_v2 = vrot.slane %v287_v30, %v3995_v20  ;;  %v302_v8 = vcombine.high %v4012_v31, %v4012_v31 }
  0x79   : > { %v1720_v5 = vshrl.u32 %v1368_v59, 16  ;;  %v1723_v6 = vshll.u32 %v1368_v59, 16  ;;  %v1371_v7 = vcombine.low %v898_v60, %v905_v61  ;;  %v919_v9 = vrot.slane %v914_v63, %v3991_v17 }
  0x7a   : > { %v1379_v10 = vrot.slane %v1369_v0, %v3995_v20  ;;  %v1386_v11 = vrot.slane %v1370_v1, %v3995_v20  ;;  %v303_v12 = vcombine.high %v301_v2, %v301_v2  ;;  %v441_v15 = vunpack.i.h.s16 %v4012_v31 }
  0x7b   : > { %v1722_v13 = vrot.slane %v1720_v5, 7  ;;  %v1393_v14 = vrot.slane %v1371_v7, %v3995_v20  ;;  %v443_v27 = vunpack.i.h.s16 %v301_v2  ;;  %v1372_v30 = vcombine.low %v912_v62, %v919_v9  ;;  %v3074_v5 = vld.sshfl [vmem:[%s3967_s11 + $0xc] sm:$0x33 pattern:$0x75316420] }
  0x7c   : > { %v1401_v16 = vcombine.low %v1379_v10, %v1386_v11  ;;  %v445_v18 = vunpack.i.h.s16 %v302_v8  ;;  %v447_v19 = vunpack.i.h.s16 %v303_v12  ;;  %v3087_v23 = vpack.i.b16 %v4012_v31, %v4012_v31 }
  0x7d   : > { %v1725_v21 = vor.u32 %v1723_v6, %v1722_v13  ;;  %v1806_v22 = vsel %vm3978_vm2, %v1722_v13, 0  ;;  %v505_v24 = vpack.i.b16 %v441_v15, %v441_v15  ;;  %v1400_v29 = vrot.slane %v1372_v30, %v3995_v20 }
  0x7e   : > { %v1835_v25 = vshll.u32 %v1806_v22, 16  ;;  %v1964_v28 = vrot.slane %v1806_v22, 1  ;;  %v1409_v32 = vrot.slane %v1401_v16, %v3995_v20  ;;  %v3088_v34 = vpack.i.b16 %v301_v2, %v301_v2 }
  0x7f   : > { %v4077_v33 = vsel %vm3978_vm2, 0, %v1725_v21  ;;  %v507_v36 = vpack.i.b16 %v443_v27, %v443_v27  ;;  %v3089_v37 = vpack.i.b16 %v302_v8, %v302_v8  ;;  %v1402_v41 = vcombine.low %v1393_v14, %v1400_v29 }
  0x80   : > { %v1828_v38 = vshrl.u32 %v4077_v33, 16  ;;  %v1830_v26 = vshll.u32 %v4077_v33, 16  ;;  %v1837_v40 = vrot.slane %v1835_v25, 1  ;;  %v1963_v31 = vrot.slane %v4077_v33, 1 }
  0x81   : > { %v509_v35 = vpack.i.b16 %v445_v18, %v445_v18  ;;  %v3090_v42 = vpack.i.b16 %v303_v12, %v303_v12  ;;  %v511_v39 = vpack.i.b16 %v447_v19, %v447_v19  ;;  %v619_v45 = vrot.slane %v3087_v23, %v3991_v17 }
  0x82   : > { %v1832_v43 = vrot.slane %v1830_v26, 1  ;;  %v1965_v44 = vsel %vm1959_vm3, %v1963_v31, %v1964_v28  ;;  %v623_v46 = vrot.slane %v505_v24, %v3991_v17  ;;  %v1416_v47 = vrot.slane %v1402_v41, %v3995_v20 }
  0x83   : > { %1989 = vrot.lane.b32.xlu1 %v1965_v44, %s3793_s18  ;;  %v627_v48 = vrot.slane %v3088_v34, %v3991_v17  ;;  %v631_v49 = vrot.slane %v507_v36, %v3991_v17  ;;  %v635_v50 = vrot.slane %v3089_v37, %v3991_v17  ;;  %v639_v52 = vrot.slane %v509_v35, %v3991_v17 }
  0x84   : > { %v1833_v51 = vor.u32 %v1832_v43, %v1828_v38  ;;  %v643_v53 = vrot.slane %v3090_v42, %v3991_v17  ;;  %v647_v54 = vrot.slane %v511_v39, %v3991_v17  ;;  %v1417_v55 = vcombine.low %v1409_v32, %v1416_v47 }
  0x85   : > { %v921_v56 = vpack.i.b16 %v619_v45, %v619_v45  ;;  %v928_v57 = vpack.i.b16 %v623_v46, %v623_v46  ;;  %v935_v58 = vpack.i.b16 %v627_v48, %v627_v48  ;;  %v942_v60 = vpack.i.b16 %v631_v49, %v631_v49 }
  0x86   : > { %v1838_v59 = vsel %vm1814_vm4, %v1833_v51, %v1837_v40  ;;  %v949_v61 = vpack.i.b16 %v635_v50, %v635_v50  ;;  %v956_v62 = vpack.i.b16 %v639_v52, %v639_v52  ;;  %v1727_v63 = vshrl.u32 %v1417_v55, 16 }
  0x87   : > { %1925 = vrot.lane.b32.xlu0 %v1838_v59, %s3794_s20  ;;  %v1730_v0 = vshll.u32 %v1417_v55, 16  ;;  %v926_v1 = vrot.slane %v921_v56, %v3991_v17  ;;  %v933_v2 = vrot.slane %v928_v57, %v3991_v17  ;;  %v940_v6 = vrot.slane %v935_v58, %v3991_v17 }
  0x88   : > { %v947_v7 = vrot.slane %v942_v60, %v3991_v17  ;;  %v954_v8 = vrot.slane %v949_v61, %v3991_v17  ;;  %v961_v9 = vrot.slane %v956_v62, %v3991_v17  ;;  %v1729_v10 = vrot.slane %v1727_v63, 7 }
  0x89   : > { %v963_v11 = vpack.i.b16 %v643_v53, %v643_v53  ;;  %v970_v12 = vpack.i.b16 %v647_v54, %v647_v54  ;;  %v1418_v13 = vcombine.low %v926_v1, %v933_v2  ;;  %v311_v27 = vcombine.high %v3074_v5, %v3074_v5 }
  0x8a   : > { %v1419_v14 = vcombine.low %v940_v6, %v947_v7  ;;  %v1420_v15 = vcombine.low %v954_v8, %v961_v9  ;;  %v318_v30 = vrot.slane %v3074_v5, %v3995_v20  ;;  %v1732_v16 = vor.u32 %v1730_v0, %v1729_v10 }
  0x8b   : > { %v1807_v18 = vsel %vm3978_vm2, %v1729_v10, 0  ;;  %v968_v19 = vrot.slane %v963_v11, %v3991_v17  ;;  %v975_v21 = vrot.slane %v970_v12, %v3991_v17  ;;  %v1428_v24 = vrot.slane %v1418_v13, %v3995_v20 }
  0x8c   : > { %v1847_v22 = vshll.u32 %v1807_v18, 16  ;;  %v1967_v23 = vrot.slane %v1807_v18, 1  ;;  %v1435_v25 = vrot.slane %v1419_v14, %v3995_v20  ;;  %v4111_v28 = vsel %vm3978_vm2, 0, %v1732_v16 }
  0x8d   : > { %v1421_v29 = vcombine.low %v968_v19, %v975_v21  ;;  %v1442_v32 = vrot.slane %v1420_v15, %v3995_v20  ;;  %v325_v34 = vrot.slane %v311_v27, %v3995_v20  ;;  %v1840_v36 = vshrl.u32 %v4111_v28, 16 }
  0x8e   : > { %v1842_v37 = vshll.u32 %v4111_v28, 16  ;;  %v1849_v38 = vrot.slane %v1847_v22, 1  ;;  %v1966_v26 = vrot.slane %v4111_v28, 1  ;;  %v1450_v31 = vcombine.low %v1428_v24, %v1435_v25 }
  0x8f   : > { %v1449_v40 = vrot.slane %v1421_v29, %v3995_v20  ;;  %v326_v41 = vcombine.high %v318_v30, %v318_v30  ;;  %v327_v35 = vcombine.high %v325_v34, %v325_v34  ;;  %v449_v43 = vunpack.i.h.s16 %v318_v30 }
  0x90   : > { %v1844_v42 = vrot.slane %v1842_v37, 1  ;;  %v1968_v39 = vsel %vm1959_vm3, %v1966_v26, %v1967_v23  ;;  %v451_v44 = vunpack.i.h.s16 %v325_v34  ;;  %v1458_v46 = vrot.slane %v1450_v31, %v3995_v20  ;;  %v3075_v23 = vld.sshfl [vmem:[%s3967_s11 + $0x10] sm:$0x33 pattern:$0x75316420] }
  0x91   : > { %1991 = vrot.lane.b32.xlu1 %v1968_v39, %s3793_s18  ;;  %v1451_v45 = vcombine.low %v1442_v32, %v1449_v40  ;;  %v453_v47 = vunpack.i.h.s16 %v326_v41  ;;  %v455_v48 = vunpack.i.h.s16 %v327_v35  ;;  %v3091_v50 = vpack.i.b16 %v318_v30, %v318_v30 }
  0x92   : > { %v1845_v49 = vor.u32 %v1844_v42, %v1840_v36  ;;  %v513_v51 = vpack.i.b16 %v449_v43, %v449_v43  ;;  %v3092_v52 = vpack.i.b16 %v325_v34, %v325_v34  ;;  %v515_v54 = vpack.i.b16 %v451_v44, %v451_v44 }
  0x93   : > { %v1465_v53 = vrot.slane %v1451_v45, %v3995_v20  ;;  %v3093_v55 = vpack.i.b16 %v326_v41, %v326_v41  ;;  %v517_v56 = vpack.i.b16 %v453_v47, %v453_v47  ;;  %v3094_v58 = vpack.i.b16 %v327_v35, %v327_v35  ;;  %v4149_v35 = vld.sshfl [vmem:[%s3967_s11 + $0x14] sm:$0x33 pattern:$0x75316420] }
  0x94   : > { %v1850_v57 = vsel %vm1814_vm4, %v1845_v49, %v1849_v38  ;;  %v519_v59 = vpack.i.b16 %v455_v48, %v455_v48  ;;  %v651_v60 = vrot.slane %v3091_v50, %v3991_v17  ;;  %v655_v62 = vrot.slane %v513_v51, %v3991_v17 }
  0x95   : > { %1927 = vrot.lane.b32.xlu0 %v1850_v57, %s3794_s20  ;;  %v1466_v61 = vcombine.low %v1458_v46, %v1465_v53  ;;  %v659_v63 = vrot.slane %v3092_v52, %v3991_v17  ;;  %v663_v0 = vrot.slane %v515_v54, %v3991_v17  ;;  %v667_v1 = vrot.slane %v3093_v55, %v3991_v17 }
  0x96   : > { %v671_v2 = vrot.slane %v517_v56, %v3991_v17  ;;  %v675_v5 = vrot.slane %v3094_v58, %v3991_v17  ;;  %v679_v6 = vrot.slane %v519_v59, %v3991_v17  ;;  %v977_v9 = vpack.i.b16 %v651_v60, %v651_v60 }
  0x97   : > { %v1734_v7 = vshrl.u32 %v1466_v61, 16  ;;  %v1737_v8 = vshll.u32 %v1466_v61, 16  ;;  %v984_v10 = vpack.i.b16 %v655_v62, %v655_v62  ;;  %v991_v11 = vpack.i.b16 %v659_v63, %v659_v63 }
  0x98   : > { %v998_v12 = vpack.i.b16 %v663_v0, %v663_v0  ;;  %v1005_v13 = vpack.i.b16 %v667_v1, %v667_v1  ;;  %v1012_v14 = vpack.i.b16 %v671_v2, %v671_v2  ;;  %v982_v27 = vrot.slane %v977_v9, %v3991_v17 }
  0x99   : > { %v1736_v15 = vrot.slane %v1734_v7, 7  ;;  %v989_v30 = vrot.slane %v984_v10, %v3991_v17  ;;  %v1019_v16 = vpack.i.b16 %v675_v5, %v675_v5  ;;  %v996_v18 = vrot.slane %v991_v11, %v3991_v17 }
  0x9a   : > { %v1003_v19 = vrot.slane %v998_v12, %v3991_v17  ;;  %v1010_v21 = vrot.slane %v1005_v13, %v3991_v17  ;;  %v1017_v22 = vrot.slane %v1012_v14, %v3991_v17  ;;  %v1026_v32 = vpack.i.b16 %v679_v6, %v679_v6 }
  0x9b   : > { %v1739_v24 = vor.u32 %v1737_v8, %v1736_v15  ;;  %v1808_v25 = vsel %vm3978_vm2, %v1736_v15, 0  ;;  %v1024_v29 = vrot.slane %v1019_v16, %v3991_v17  ;;  %v1467_v37 = vcombine.low %v982_v27, %v989_v30 }
  0x9c   : > { %v1859_v34 = vshll.u32 %v1808_v25, 16  ;;  %v1970_v36 = vrot.slane %v1808_v25, 1  ;;  %v1468_v38 = vcombine.low %v996_v18, %v1003_v19  ;;  %v1031_v40 = vrot.slane %v1026_v32, %v3991_v17 }
  0x9d   : > { %v4145_v26 = vsel %vm3978_vm2, 0, %v1739_v24  ;;  %v1469_v31 = vcombine.low %v1010_v21, %v1017_v22  ;;  %v335_v41 = vcombine.high %v3075_v23, %v3075_v23  ;;  %v1477_v46 = vrot.slane %v1467_v37, %v3995_v20 }
  0x9e   : > { %v1852_v42 = vshrl.u32 %v4145_v26, 16  ;;  %v1854_v39 = vshll.u32 %v4145_v26, 16  ;;  %v1861_v43 = vrot.slane %v1859_v34, 1  ;;  %v1969_v44 = vrot.slane %v4145_v26, 1 }
  0x9f   : > { %v1470_v45 = vcombine.low %v1024_v29, %v1031_v40  ;;  %v1484_v47 = vrot.slane %v1468_v38, %v3995_v20  ;;  %v1491_v48 = vrot.slane %v1469_v31, %v3995_v20  ;;  %v342_v51 = vrot.slane %v3075_v23, %v3995_v20 }
  0xa0   : > { %v1856_v49 = vrot.slane %v1854_v39, 1  ;;  %v1971_v50 = vsel %vm1959_vm3, %v1969_v44, %v1970_v36  ;;  %v349_v52 = vrot.slane %v335_v41, %v3995_v20  ;;  %v359_v55 = vcombine.high %v4149_v35, %v4149_v35 }
  0xa1   : > { %1993 = vrot.lane.b32.xlu1 %v1971_v50, %s3793_s18  ;;  %v1498_v53 = vrot.slane %v1470_v45, %v3995_v20  ;;  %v1499_v54 = vcombine.low %v1477_v46, %v1484_v47  ;;  %v4166_v56 = vrot.slane %v4149_v35, %v3995_v20  ;;  %v350_v58 = vcombine.high %v342_v51, %v342_v51 }
  0xa2   : > { %v1857_v57 = vor.u32 %v1856_v49, %v1852_v42  ;;  %v351_v59 = vcombine.high %v349_v52, %v349_v52  ;;  %v457_v60 = vunpack.i.h.s16 %v342_v51  ;;  %v459_v63 = vunpack.i.h.s16 %v349_v52 }
  0xa3   : > { %v1500_v61 = vcombine.low %v1491_v48, %v1498_v53  ;;  %v1507_v62 = vrot.slane %v1499_v54, %v3995_v20  ;;  %v3095_v0 = vpack.i.b16 %v342_v51, %v342_v51  ;;  %v461_v2 = vunpack.i.h.s16 %v350_v58 }
  0xa4   : > { %v1862_v1 = vsel %vm1814_vm4, %v1857_v57, %v1861_v43  ;;  %v463_v5 = vunpack.i.h.s16 %v351_v59  ;;  %v521_v6 = vpack.i.b16 %v457_v60, %v457_v60  ;;  %v3096_v8 = vpack.i.b16 %v349_v52, %v349_v52 }
  0xa5   : > { %1929 = vrot.lane.b32.xlu0 %v1862_v1, %s3794_s20  ;;  %v1514_v7 = vrot.slane %v1500_v61, %v3995_v20  ;;  %v523_v9 = vpack.i.b16 %v459_v63, %v459_v63  ;;  %v3097_v10 = vpack.i.b16 %v350_v58, %v350_v58  ;;  %v525_v11 = vpack.i.b16 %v461_v2, %v461_v2 }
  0xa6   : > { %v3098_v12 = vpack.i.b16 %v351_v59, %v351_v59  ;;  %v527_v13 = vpack.i.b16 %v463_v5, %v463_v5  ;;  %v683_v14 = vrot.slane %v3095_v0, %v3991_v17  ;;  %v687_v27 = vrot.slane %v521_v6, %v3991_v17 }
  0xa7   : > { %v1515_v15 = vcombine.low %v1507_v62, %v1514_v7  ;;  %v691_v30 = vrot.slane %v3096_v8, %v3991_v17  ;;  %v695_v16 = vrot.slane %v523_v9, %v3991_v17  ;;  %v699_v18 = vrot.slane %v3097_v10, %v3991_v17 }
  0xa8   : > { %v703_v19 = vrot.slane %v525_v11, %v3991_v17  ;;  %v707_v21 = vrot.slane %v3098_v12, %v3991_v17  ;;  %v711_v22 = vrot.slane %v527_v13, %v3991_v17  ;;  %v1033_v25 = vpack.i.b16 %v683_v14, %v683_v14 }
  0xa9   : > { %v1741_v23 = vshrl.u32 %v1515_v15, 16  ;;  %v1744_v24 = vshll.u32 %v1515_v15, 16  ;;  %v1040_v29 = vpack.i.b16 %v687_v27, %v687_v27  ;;  %v1047_v32 = vpack.i.b16 %v691_v30, %v691_v30 }
  0xaa   : > { %v1054_v34 = vpack.i.b16 %v695_v16, %v695_v16  ;;  %v1061_v36 = vpack.i.b16 %v699_v18, %v699_v18  ;;  %v1068_v37 = vpack.i.b16 %v703_v19, %v703_v19  ;;  %v1038_v40 = vrot.slane %v1033_v25, %v3991_v17 }
  0xab   : > { %v1743_v38 = vrot.slane %v1741_v23, 7  ;;  %v1045_v31 = vrot.slane %v1040_v29, %v3991_v17  ;;  %v1075_v41 = vpack.i.b16 %v707_v21, %v707_v21  ;;  %v1052_v35 = vrot.slane %v1047_v32, %v3991_v17 }
  0xac   : > { %v1059_v42 = vrot.slane %v1054_v34, %v3991_v17  ;;  %v1066_v39 = vrot.slane %v1061_v36, %v3991_v17  ;;  %v1073_v43 = vrot.slane %v1068_v37, %v3991_v17  ;;  %v1082_v47 = vpack.i.b16 %v711_v22, %v711_v22 }
  0xad   : > { %v1746_v44 = vor.u32 %v1744_v24, %v1743_v38  ;;  %v1809_v45 = vsel %vm3978_vm2, %v1743_v38, 0  ;;  %v1080_v46 = vrot.slane %v1075_v41, %v3991_v17  ;;  %v1516_v50 = vcombine.low %v1038_v40, %v1045_v31 }
  0xae   : > { %v1871_v48 = vshll.u32 %v1809_v45, 16  ;;  %v1973_v49 = vrot.slane %v1809_v45, 1  ;;  %v1517_v51 = vcombine.low %v1052_v35, %v1059_v42  ;;  %v1087_v53 = vrot.slane %v1082_v47, %v3991_v17  ;;  %v3077_v47 = vld.sshfl [vmem:[%s3967_s11 + $0x18] sm:$0x33 pattern:$0x75316420] }
  0xaf   : > { %v4191_v52 = vsel %vm3978_vm2, 0, %v1746_v44  ;;  %v1518_v54 = vcombine.low %v1066_v39, %v1073_v43  ;;  %v373_v57 = vrot.slane %v359_v55, %v3995_v20  ;;  %v1526_v63 = vrot.slane %v1516_v50, %v3995_v20 }
  0xb0   : > { %v1864_v58 = vshrl.u32 %v4191_v52, 16  ;;  %v1866_v59 = vshll.u32 %v4191_v52, 16  ;;  %v1873_v60 = vrot.slane %v1871_v48, 1  ;;  %v1972_v61 = vrot.slane %v4191_v52, 1 }
  0xb1   : > { %v1519_v62 = vcombine.low %v1080_v46, %v1087_v53  ;;  %v1533_v0 = vrot.slane %v1517_v51, %v3995_v20  ;;  %v1540_v1 = vrot.slane %v1518_v54, %v3995_v20  ;;  %v374_v55 = vcombine.high %v4166_v56, %v4166_v56 }
  0xb2   : > { %v1868_v2 = vrot.slane %v1866_v59, 1  ;;  %v1974_v5 = vsel %vm1959_vm3, %v1972_v61, %v1973_v49  ;;  %v375_v6 = vcombine.high %v373_v57, %v373_v57  ;;  %v465_v9 = vunpack.i.h.s16 %v4166_v56 }
  0xb3   : > { %1995 = vrot.lane.b32.xlu1 %v1974_v5, %s3793_s18  ;;  %v1547_v7 = vrot.slane %v1519_v62, %v3995_v20  ;;  %v1548_v8 = vcombine.low %v1526_v63, %v1533_v0  ;;  %v467_v10 = vunpack.i.h.s16 %v373_v57  ;;  %v469_v12 = vunpack.i.h.s16 %v374_v55 }
  0xb4   : > { %v1869_v11 = vor.u32 %v1868_v2, %v1864_v58  ;;  %v471_v13 = vunpack.i.h.s16 %v375_v6  ;;  %v3099_v14 = vpack.i.b16 %v4166_v56, %v4166_v56  ;;  %v529_v30 = vpack.i.b16 %v465_v9, %v465_v9 }
  0xb5   : > { %v1549_v15 = vcombine.low %v1540_v1, %v1547_v7  ;;  %v1556_v27 = vrot.slane %v1548_v8, %v3995_v20  ;;  %v3100_v16 = vpack.i.b16 %v373_v57, %v373_v57  ;;  %v531_v19 = vpack.i.b16 %v467_v10, %v467_v10 }
  0xb6   : > { %v1874_v18 = vsel %vm1814_vm4, %v1869_v11, %v1873_v60  ;;  %v3101_v21 = vpack.i.b16 %v374_v55, %v374_v55  ;;  %v533_v22 = vpack.i.b16 %v469_v12, %v469_v12  ;;  %v3102_v24 = vpack.i.b16 %v375_v6, %v375_v6 }
  0xb7   : > { %1931 = vrot.lane.b32.xlu0 %v1874_v18, %s3794_s20  ;;  %v1563_v23 = vrot.slane %v1549_v15, %v3995_v20  ;;  %v535_v25 = vpack.i.b16 %v471_v13, %v471_v13  ;;  %v715_v29 = vrot.slane %v3099_v14, %v3991_v17  ;;  %v719_v56 = vrot.slane %v529_v30, %v3991_v17 }
  0xb8   : > { %v723_v32 = vrot.slane %v3100_v16, %v3991_v17  ;;  %v727_v34 = vrot.slane %v531_v19, %v3991_v17  ;;  %v731_v36 = vrot.slane %v3101_v21, %v3991_v17  ;;  %v735_v38 = vrot.slane %v533_v22, %v3991_v17 }
  0xb9   : > { %v1564_v37 = vcombine.low %v1556_v27, %v1563_v23  ;;  %v739_v40 = vrot.slane %v3102_v24, %v3991_v17  ;;  %v743_v31 = vrot.slane %v535_v25, %v3991_v17  ;;  %v1089_v41 = vpack.i.b16 %v715_v29, %v715_v29 }
  0xba   : > { %v1096_v35 = vpack.i.b16 %v719_v56, %v719_v56  ;;  %v1103_v42 = vpack.i.b16 %v723_v32, %v723_v32  ;;  %v1110_v39 = vpack.i.b16 %v727_v34, %v727_v34  ;;  %v1117_v45 = vpack.i.b16 %v731_v36, %v731_v36 }
  0xbb   : > { %v1748_v43 = vshrl.u32 %v1564_v37, 16  ;;  %v1751_v44 = vshll.u32 %v1564_v37, 16  ;;  %v1124_v46 = vpack.i.b16 %v735_v38, %v735_v38  ;;  %v1094_v48 = vrot.slane %v1089_v41, %v3991_v17 }
  0xbc   : > { %v1101_v49 = vrot.slane %v1096_v35, %v3991_v17  ;;  %v1108_v50 = vrot.slane %v1103_v42, %v3991_v17  ;;  %v1115_v51 = vrot.slane %v1110_v39, %v3991_v17  ;;  %v1122_v54 = vrot.slane %v1117_v45, %v3991_v17 }
  0xbd   : > { %v1750_v53 = vrot.slane %v1748_v43, 7  ;;  %v1129_v57 = vrot.slane %v1124_v46, %v3991_v17  ;;  %v1131_v58 = vpack.i.b16 %v739_v40, %v739_v40  ;;  %v1138_v59 = vpack.i.b16 %v743_v31, %v743_v31 }
  0xbe   : > { %v1565_v60 = vcombine.low %v1094_v48, %v1101_v49  ;;  %v1566_v61 = vcombine.low %v1108_v50, %v1115_v51  ;;  %v383_v62 = vcombine.high %v3077_v47, %v3077_v47  ;;  %v390_v11 = vrot.slane %v3077_v47, %v3995_v20 }
  0xbf   : > { %v1753_v63 = vor.u32 %v1751_v44, %v1750_v53  ;;  %v1810_v0 = vsel %vm3978_vm2, %v1750_v53, 0  ;;  %v1136_v1 = vrot.slane %v1131_v58, %v3991_v17  ;;  %v1567_v2 = vcombine.low %v1122_v54, %v1129_v57 }
  0xc0   : > { %v1883_v5 = vshll.u32 %v1810_v0, 16  ;;  %v1976_v55 = vrot.slane %v1810_v0, 1  ;;  %v1143_v6 = vrot.slane %v1138_v59, %v3991_v17  ;;  %v1575_v7 = vrot.slane %v1565_v60, %v3995_v20 }
  0xc1   : > { %v4235_v8 = vsel %vm3978_vm2, 0, %v1753_v63  ;;  %v1582_v9 = vrot.slane %v1566_v61, %v3995_v20  ;;  %v1589_v10 = vrot.slane %v1567_v2, %v3995_v20  ;;  %v397_v16 = vrot.slane %v383_v62, %v3995_v20 }
  0xc2   : > { %v1876_v12 = vshrl.u32 %v4235_v8, 16  ;;  %v1878_v13 = vshll.u32 %v4235_v8, 16  ;;  %v1885_v14 = vrot.slane %v1883_v5, 1  ;;  %v1975_v15 = vrot.slane %v4235_v8, 1 }
  0xc3   : > { %v1568_v27 = vcombine.low %v1136_v1, %v1143_v6  ;;  %v1597_v30 = vcombine.low %v1575_v7, %v1582_v9  ;;  %v398_v18 = vcombine.high %v390_v11, %v390_v11  ;;  %v473_v22 = vunpack.i.h.s16 %v390_v11  ;;  %v3078_v5 = vld.sshfl [vmem:[%s3967_s11 + $0x1c] sm:$0x33 pattern:$0x75316420] }
  0xc4   : > { %v1880_v19 = vrot.slane %v1878_v13, 1  ;;  %v1977_v21 = vsel %vm1959_vm3, %v1975_v15, %v1976_v55  ;;  %v3103_v23 = vpack.i.b16 %v390_v11, %v390_v11  ;;  %v399_v29 = vcombine.high %v397_v16, %v397_v16 }
  0xc5   : > { %1997 = vrot.lane.b32.xlu1 %v1977_v21, %s3793_s18  ;;  %v1596_v24 = vrot.slane %v1568_v27, %v3995_v20  ;;  %v1605_v25 = vrot.slane %v1597_v30, %v3995_v20  ;;  %v475_v56 = vunpack.i.h.s16 %v397_v16  ;;  %v477_v34 = vunpack.i.h.s16 %v398_v18 }
  0xc6   : > { %v1881_v32 = vor.u32 %v1880_v19, %v1876_v12  ;;  %v537_v36 = vpack.i.b16 %v473_v22, %v473_v22  ;;  %v3104_v37 = vpack.i.b16 %v397_v16, %v397_v16  ;;  %v479_v40 = vunpack.i.h.s16 %v399_v29 }
  0xc7   : > { %v1598_v38 = vcombine.low %v1589_v10, %v1596_v24  ;;  %v539_v31 = vpack.i.b16 %v475_v56, %v475_v56  ;;  %v3105_v41 = vpack.i.b16 %v398_v18, %v398_v18  ;;  %v541_v42 = vpack.i.b16 %v477_v34, %v477_v34 }
  0xc8   : > { %v1886_v35 = vsel %vm1814_vm4, %v1881_v32, %v1885_v14  ;;  %v3106_v39 = vpack.i.b16 %v399_v29, %v399_v29  ;;  %v747_v43 = vrot.slane %v3103_v23, %v3991_v17  ;;  %v543_v45 = vpack.i.b16 %v479_v40, %v479_v40 }
  0xc9   : > { %1933 = vrot.lane.b32.xlu0 %v1886_v35, %s3794_s20  ;;  %v1612_v44 = vrot.slane %v1598_v38, %v3995_v20  ;;  %v751_v46 = vrot.slane %v537_v36, %v3991_v17  ;;  %v755_v47 = vrot.slane %v3104_v37, %v3991_v17  ;;  %v759_v48 = vrot.slane %v539_v31, %v3991_v17 }
  0xca   : > { %v763_v49 = vrot.slane %v3105_v41, %v3991_v17  ;;  %v767_v50 = vrot.slane %v541_v42, %v3991_v17  ;;  %v771_v51 = vrot.slane %v3106_v39, %v3991_v17  ;;  %v775_v54 = vrot.slane %v543_v45, %v3991_v17 }
  0xcb   : > { %v1613_v53 = vcombine.low %v1605_v25, %v1612_v44  ;;  %v1145_v57 = vpack.i.b16 %v747_v43, %v747_v43  ;;  %v1152_v58 = vpack.i.b16 %v751_v46, %v751_v46  ;;  %v1159_v59 = vpack.i.b16 %v755_v47, %v755_v47 }
  0xcc   : > { %v1166_v60 = vpack.i.b16 %v759_v48, %v759_v48  ;;  %v1173_v61 = vpack.i.b16 %v763_v49, %v763_v49  ;;  %v1180_v62 = vpack.i.b16 %v767_v50, %v767_v50  ;;  %v1187_v11 = vpack.i.b16 %v771_v51, %v771_v51 }
  0xcd   : > { %v1755_v63 = vshrl.u32 %v1613_v53, 16  ;;  %v1758_v0 = vshll.u32 %v1613_v53, 16  ;;  %v1150_v1 = vrot.slane %v1145_v57, %v3991_v17  ;;  %v1157_v2 = vrot.slane %v1152_v58, %v3991_v17 }
  0xce   : > { %v1164_v55 = vrot.slane %v1159_v59, %v3991_v17  ;;  %v1171_v6 = vrot.slane %v1166_v60, %v3991_v17  ;;  %v1178_v7 = vrot.slane %v1173_v61, %v3991_v17  ;;  %v1185_v9 = vrot.slane %v1180_v62, %v3991_v17 }
  0xcf   : > { %v1757_v10 = vrot.slane %v1755_v63, 7  ;;  %v1194_v12 = vpack.i.b16 %v775_v54, %v775_v54  ;;  %v1614_v13 = vcombine.low %v1150_v1, %v1157_v2  ;;  %v407_v27 = vcombine.high %v3078_v5, %v3078_v5 }
  0xd0   : > { %v1615_v14 = vcombine.low %v1164_v55, %v1171_v6  ;;  %v1616_v15 = vcombine.low %v1178_v7, %v1185_v9  ;;  %v414_v30 = vrot.slane %v3078_v5, %v3995_v20  ;;  %v1192_v19 = vrot.slane %v1187_v11, %v3991_v17 }
  0xd1   : > { %v1760_v16 = vor.u32 %v1758_v0, %v1757_v10  ;;  %v1811_v18 = vsel %vm3978_vm2, %v1757_v10, 0  ;;  %v1199_v21 = vrot.slane %v1194_v12, %v3991_v17  ;;  %v1624_v24 = vrot.slane %v1614_v13, %v3995_v20 }
  0xd2   : > { %v1895_v22 = vshll.u32 %v1811_v18, 16  ;;  %v1979_v23 = vrot.slane %v1811_v18, 1  ;;  %v1631_v25 = vrot.slane %v1615_v14, %v3995_v20  ;;  %v1638_v32 = vrot.slane %v1616_v15, %v3995_v20 }
  0xd3   : > { %v4275_v29 = vsel %vm3978_vm2, 0, %v1760_v16  ;;  %v1617_v56 = vcombine.low %v1192_v19, %v1199_v21  ;;  %v421_v34 = vrot.slane %v407_v27, %v3995_v20  ;;  %v422_v35 = vcombine.high %v414_v30, %v414_v30 }
  0xd4   : > { %v1888_v36 = vshrl.u32 %v4275_v29, 16  ;;  %v1890_v37 = vshll.u32 %v4275_v29, 16  ;;  %v1897_v38 = vrot.slane %v1895_v22, 1  ;;  %v1978_v40 = vrot.slane %v4275_v29, 1 }
  0xd5   : > { %v1645_v31 = vrot.slane %v1617_v56, %v3995_v20  ;;  %v1646_v41 = vcombine.low %v1624_v24, %v1631_v25  ;;  %v423_v42 = vcombine.high %v421_v34, %v421_v34  ;;  %v481_v44 = vunpack.i.h.s16 %v414_v30 }
  0xd6   : > { %v1892_v39 = vrot.slane %v1890_v37, 1  ;;  %v1980_v43 = vsel %vm1959_vm3, %v1978_v40, %v1979_v23  ;;  %v483_v45 = vunpack.i.h.s16 %v421_v34  ;;  %v485_v48 = vunpack.i.h.s16 %v422_v35 }
  0xd7   : > { %1999 = vrot.lane.b32.xlu1 %v1980_v43, %s3793_s18  ;;  %v1647_v46 = vcombine.low %v1638_v32, %v1645_v31  ;;  %v1654_v47 = vrot.slane %v1646_v41, %v3995_v20  ;;  %v487_v49 = vunpack.i.h.s16 %v423_v42  ;;  %v3107_v51 = vpack.i.b16 %v414_v30, %v414_v30  ;;  %v1924_v43 = vpop.permute.xlu0 %1923 }
  0xd8   : > { %v1893_v50 = vor.u32 %v1892_v39, %v1888_v36  ;;  %v545_v53 = vpack.i.b16 %v481_v44, %v481_v44  ;;  %v3108_v54 = vpack.i.b16 %v421_v34, %v421_v34  ;;  %v547_v58 = vpack.i.b16 %v483_v45, %v483_v45  ;;  %v3622_v44 = vld [vmem:[#allocation5 + $0x8] sm:$0x3f]  }
  0xd9   : > { %v1661_v57 = vrot.slane %v1647_v46, %v3995_v20  ;;  %v3109_v59 = vpack.i.b16 %v422_v35, %v422_v35  ;;  %v549_v60 = vpack.i.b16 %v485_v48, %v485_v48  ;;  %v3110_v62 = vpack.i.b16 %v423_v42, %v423_v42  ;;  %3549 = vmatprep.subr.msk.bf16.mxu1 %vm2070_vm6, %v3622_v44 }
  0xda   : > { %v1898_v61 = vsel %vm1814_vm4, %v1893_v50, %v1897_v38  ;;  %v551_v63 = vpack.i.b16 %v487_v49, %v487_v49  ;;  %v779_v0 = vrot.slane %v3107_v51, %v3991_v17  ;;  %v783_v2 = vrot.slane %v545_v53, %v3991_v17  ;;  %v3623_v49 = vld [vmem:[#allocation5] sm:$0x3f]  }
  0xdb   : > { %1935 = vrot.lane.b32.xlu0 %v1898_v61, %s3794_s20  ;;  %v1662_v1 = vcombine.low %v1654_v47, %v1661_v57  ;;  %v787_v5 = vrot.slane %v3108_v54, %v3991_v17  ;;  %v791_v55 = vrot.slane %v547_v58, %v3991_v17  ;;  %v795_v6 = vrot.slane %v3109_v59, %v3991_v17 }
  0xdc   : > { %v799_v7 = vrot.slane %v549_v60, %v3991_v17  ;;  %v803_v9 = vrot.slane %v3110_v62, %v3991_v17  ;;  %v807_v10 = vrot.slane %v551_v63, %v3991_v17  ;;  %v1201_v13 = vpack.i.b16 %v779_v0, %v779_v0  ;;  %v3624_v62 = vld [vmem:[#allocation5 + $0x10] sm:$0x3f]   ;;  %3550 = vmatprep.subr.msk.bf16.mxu0 %vm2070_vm6, %v3623_v49 }
  0xdd   : > { %v1762_v11 = vshrl.u32 %v1662_v1, 16  ;;  %v1765_v12 = vshll.u32 %v1662_v1, 16  ;;  %v1208_v14 = vpack.i.b16 %v783_v2, %v783_v2  ;;  %v1215_v15 = vpack.i.b16 %v787_v5, %v787_v5 }
  0xde   : > { %v1222_v27 = vpack.i.b16 %v791_v55, %v791_v55  ;;  %v1229_v30 = vpack.i.b16 %v795_v6, %v795_v6  ;;  %v1236_v16 = vpack.i.b16 %v799_v7, %v799_v7  ;;  %v1206_v19 = vrot.slane %v1201_v13, %v3991_v17 }
  0xdf   : > { %v1764_v18 = vrot.slane %v1762_v11, 7  ;;  %v1213_v21 = vrot.slane %v1208_v14, %v3991_v17  ;;  %v1243_v22 = vpack.i.b16 %v803_v9, %v803_v9  ;;  %v1220_v23 = vrot.slane %v1215_v15, %v3991_v17 }
  0xe0   : > { %v1227_v24 = vrot.slane %v1222_v27, %v3991_v17  ;;  %v1234_v25 = vrot.slane %v1229_v30, %v3991_v17  ;;  %v1241_v56 = vrot.slane %v1236_v16, %v3991_v17  ;;  %v1250_v37 = vpack.i.b16 %v807_v10, %v807_v10 }
  0xe1   : > { %v1767_v32 = vor.u32 %v1765_v12, %v1764_v18  ;;  %v1812_v34 = vsel %vm3978_vm2, %v1764_v18, 0  ;;  %v1248_v36 = vrot.slane %v1243_v22, %v3991_v17  ;;  %v1663_v31 = vcombine.low %v1206_v19, %v1213_v21 }
  0xe2   : > { %v1907_v38 = vshll.u32 %v1812_v34, 16  ;;  %v1982_v40 = vrot.slane %v1812_v34, 1  ;;  %v1664_v41 = vcombine.low %v1220_v23, %v1227_v24  ;;  %v1255_v42 = vrot.slane %v1250_v37, %v3991_v17  ;;  %v1988_v17 = vpop.permute.xlu1 %1987 }
  0xe3   : > { %v4308_v35 = vsel %vm3978_vm2, 0, %v1767_v32  ;;  %v1665_v39 = vcombine.low %v1234_v25, %v1241_v56  ;;  %v1673_v51 = vrot.slane %v1663_v31, %v3995_v20  ;;  %v2007_v59 = vsel %vm2005_vm5, %v3984_v4, %v1924_v43 }
  0xe4   : > { %v1900_v45 = vshrl.u32 %v4308_v35, 16  ;;  %v1902_v46 = vshll.u32 %v4308_v35, 16  ;;  %v1909_v47 = vrot.slane %v1907_v38, 1  ;;  %v1981_v48 = vrot.slane %v4308_v35, 1 }
  0xe5   : > { %v1666_v50 = vcombine.low %v1248_v36, %v1255_v42  ;;  %v1680_v53 = vrot.slane %v1664_v41, %v3995_v20  ;;  %v1687_v54 = vrot.slane %v1665_v39, %v3995_v20  ;;  %v4325_v0 = vsel %vm2024_vm7, %v2007_v59, %v1988_v17 }
  0xe6   : > { %v1904_v57 = vrot.slane %v1902_v46, 1  ;;  %v1983_v58 = vsel %vm1959_vm3, %v1981_v48, %v1982_v40  ;;  %v2072_v1 = vsel %vm2070_vm6, %v3622_v44, 0  ;;  %v2243_v4 = vsel %vm2070_vm6, %v3623_v49, 0  ;;  %3417 = vmatprep.mubr.msk.bf16.mxu0 %vm2053_vm8, %v4325_v0 }
  0xe7   : > { %2001 = vrot.lane.b32.xlu1 %v1983_v58, %s3793_s18  ;;  %v1694_v60 = vrot.slane %v1666_v50, %v3995_v20  ;;  %v1695_v61 = vcombine.low %v1673_v51, %v1680_v53  ;;  %3382 = vmatpush3.bf16.msra.mxu1 %v2072_v1  ;;  %v2415_v32 = vsel %vm2070_vm6, %v3624_v62, 0 }
  0xe8   : > { %v1905_v63 = vor.u32 %v1904_v57, %v1900_v45  ;;  %3416 = vmatpush3.bf16.msra.mxu0 %v2243_v4  ;;  %3551 = vmatprep.subr.msk.bf16.mxu1 %vm2070_vm6, %v3623_v49 }
  0xe9   : > { %v1696_v2 = vcombine.low %v1687_v54, %v1694_v60  ;;  %v1703_v5 = vrot.slane %v1695_v61, %v3995_v20  ;;  %3552 = vmatprep.subr.msk.bf16.mxu0 %vm2070_vm6, %v3624_v62 }
  0xea   : > { %v1910_v55 = vsel %vm1814_vm4, %v1905_v63, %v1909_v47 }
  0xeb   : > { %1937 = vrot.lane.b32.xlu0 %v1910_v55, %s3794_s20  ;;  %v1710_v6 = vrot.slane %v1696_v2, %v3995_v20 }
  0xed   : > { %v1711_v7 = vcombine.low %v1703_v5, %v1710_v6 }
  0xef   : > { %v1769_v9 = vshrl.u32 %v1711_v7, 16  ;;  %v1772_v10 = vshll.u32 %v1711_v7, 16 }
  0xf1   : > { %v1771_v11 = vrot.slane %v1769_v9, 7 }
  0xf3   : > { %v1774_v12 = vor.u32 %v1772_v10, %v1771_v11  ;;  %v1813_v13 = vsel %vm3978_vm2, %v1771_v11, 0 }
  0xf4   : > { %v1919_v14 = vshll.u32 %v1813_v13, 16  ;;  %v1985_v15 = vrot.slane %v1813_v13, 1 }
  0xf5   : > { %v4341_v27 = vsel %vm3978_vm2, 0, %v1774_v12  ;;  %v1990_v22 = vpop.permute.xlu1 %1989 }
  0xf6   : > { %v1912_v30 = vshrl.u32 %v4341_v27, 16  ;;  %v1914_v20 = vshll.u32 %v4341_v27, 16  ;;  %v1984_v16 = vrot.slane %v4341_v27, 1  ;;  %v1921_v19 = vrot.slane %v1919_v14, 1 }
  0xf8   : > { %v1916_v18 = vrot.slane %v1914_v20, 1  ;;  %v1986_v21 = vsel %vm1959_vm3, %v1984_v16, %v1985_v15 }
  0xf9   : > { %2003 = vrot.lane.b32.xlu1 %v1986_v21, %s3793_s18  ;;  %v1926_v23 = vpop.permute.xlu0 %1925 }
  0xfa   : > { %v1917_v24 = vor.u32 %v1916_v18, %v1912_v30  ;;  %v2009_v3 = vsel %vm2005_vm5, %v4077_v33, %v1926_v23 }
  0xfb   : > { %v2028_v25 = vsel %vm2024_vm7, %v2009_v3, %v1990_v22 }
  0xfc   : > { %v1922_v56 = vsel %vm1814_vm4, %v1917_v24, %v1921_v19  ;;  %3383 = vmatprep.mubr.msk.bf16.mxu1 %vm2053_vm8, %v2028_v25  ;;  %3418 = vmatmul.mubr.msk.bf16.vlgmr.msra.gmra.mrb[0].mxu0 %vm2053_vm8, %v2028_v25 }
  0xfd   : > { %1939 = vrot.lane.b32.xlu0 %v1922_v56, %s3794_s20  ;;  %3384 = vmatmul.mubr.msk.bf16.vlgmr.msra.gmra.mrb[0].mxu1 %vm2053_vm8, %v2028_v25 }
  0xfe   : > { %3484 = vmatpush3.bf16.msra.mxu1 %v2243_v4  ;;  %3421 = vmatprep.mubr.msk.bf16.mxu0 %vm2053_vm8, %v2028_v25 }
  0xff   : > { %3450 = vmatpush3.bf16.msra.mxu0 %v2415_v32 }
 0x103   : > { %v1992_v34 = vpop.permute.xlu1 %1991 }
 0x107   : > { %v1928_v33 = vpop.permute.xlu0 %1927 }
 0x108   : > { %v2011_v36 = vsel %vm2005_vm5, %v4111_v28, %v1928_v33 }
 0x109   : > { %v2030_v37 = vsel %vm2024_vm7, %v2011_v36, %v1992_v34 }
 0x10a   : > { %3387 = vmatprep.mubr.msk.bf16.mxu1 %vm2053_vm8, %v2030_v37  ;;  %3422 = vmatmul.mubr.msk.bf16.gmra.mrb[4].mxu0 %vm2053_vm8, %v2030_v37 }
 0x10b   : > { %3388 = vmatmul.mubr.msk.bf16.gmra.mrb[4].mxu1 %vm2053_vm8, %v2030_v37  ;;  %3425 = vmatprep.mubr.msk.bf16.mxu0 %vm2053_vm8, %v2030_v37 }
 0x113   : > { %v1994_v38 = vpop.permute.xlu1 %1993 }
 0x117   : > { %v1930_v40 = vpop.permute.xlu0 %1929 }
 0x118   : > { %v2013_v31 = vsel %vm2005_vm5, %v4145_v26, %v1930_v40 }
 0x119   : > { %v2032_v41 = vsel %vm2024_vm7, %v2013_v31, %v1994_v38 }
 0x11a   : > { %3391 = vmatprep.mubr.msk.bf16.mxu1 %vm2053_vm8, %v2032_v41  ;;  %3426 = vmatmul.mubr.msk.bf16.gmra.mrb[8].mxu0 %vm2053_vm8, %v2032_v41 }
 0x11b   : > { %3392 = vmatmul.mubr.msk.bf16.gmra.mrb[8].mxu1 %vm2053_vm8, %v2032_v41  ;;  %3429 = vmatprep.mubr.msk.bf16.mxu0 %vm2053_vm8, %v2032_v41 }
 0x125   : > { %v1996_v28 = vpop.permute.xlu1 %1995 }
 0x129   : > { %v1932_v42 = vpop.permute.xlu0 %1931 }
 0x12a   : > { %v2015_v39 = vsel %vm2005_vm5, %v4191_v52, %v1932_v42 }
 0x12b   : > { %v2034_v43 = vsel %vm2024_vm7, %v2015_v39, %v1996_v28 }
 0x12c   : > { %3395 = vmatprep.mubr.msk.bf16.mxu1 %vm2053_vm8, %v2034_v43  ;;  %3430 = vmatmul.mubr.msk.bf16.gmra.mrb[12].mxu0 %vm2053_vm8, %v2034_v43 }
 0x12d   : > { %3396 = vmatmul.mubr.msk.bf16.gmra.mrb[12].mxu1 %vm2053_vm8, %v2034_v43  ;;  %3451 = vmatprep.mubr.msk.bf16.mxu0 %vm2053_vm8, %v2028_v25 }
 0x134   : > { %3452 = vmatmul.mubr.msk.bf16.vlgmr.msra.gmra.mrb[0].mxu0 %vm2053_vm8, %v2030_v37 }
 0x135   : > { %3455 = vmatprep.mubr.msk.bf16.mxu0 %vm2053_vm8, %v2030_v37 }
 0x137   : > { %v1998_v26 = vpop.permute.xlu1 %1997 }
 0x13b   : > { %v1934_v44 = vpop.permute.xlu0 %1933 }
 0x13c   : > { %v2017_v45 = vsel %vm2005_vm5, %v4235_v8, %v1934_v44  ;;  %3456 = vmatmul.mubr.msk.bf16.gmra.mrb[4].mxu0 %vm2053_vm8, %v2032_v41 }
 0x13d   : > { %v2036_v52 = vsel %vm2024_vm7, %v2017_v45, %v1998_v26  ;;  %3459 = vmatprep.mubr.msk.bf16.mxu0 %vm2053_vm8, %v2032_v41 }
 0x13e   : > { %3399 = vmatprep.mubr.msk.bf16.mxu1 %vm2053_vm8, %v2036_v52 }
 0x13f   : > { %3400 = vmatmul.mubr.msk.bf16.gmra.mrb[16].mxu1 %vm2053_vm8, %v2036_v52 }
 0x144   : > { %3460 = vmatmul.mubr.msk.bf16.gmra.mrb[8].mxu0 %vm2053_vm8, %v2034_v43 }
 0x145   : > { %3463 = vmatprep.mubr.msk.bf16.mxu0 %vm2053_vm8, %v2034_v43 }
 0x149   : > { %v2000_v46 = vpop.permute.xlu1 %1999 }
 0x14c   : > { %3464 = vmatmul.mubr.msk.bf16.gmra.mrb[12].mxu0 %vm2053_vm8, %v2036_v52 }
 0x14d   : > { %v1936_v47 = vpop.permute.xlu0 %1935  ;;  %3467 = vmatprep.mubr.msk.bf16.mxu0 %vm2053_vm8, %v2036_v52 }
 0x14e   : > { %v2019_v8 = vsel %vm2005_vm5, %v4275_v29, %v1936_v47 }
 0x14f   : > { %v2038_v48 = vsel %vm2024_vm7, %v2019_v8, %v2000_v46 }
 0x150   : > { %3403 = vmatprep.mubr.msk.bf16.mxu1 %vm2053_vm8, %v2038_v48 }
 0x151   : > { %3404 = vmatmul.mubr.msk.bf16.gmra.mrb[20].mxu1 %vm2053_vm8, %v2038_v48 }
 0x154   : > { %3468 = vmatmul.mubr.msk.bf16.gmra.mrb[16].mxu0 %vm2053_vm8, %v2038_v48 }
 0x155   : > { %3471 = vmatprep.mubr.msk.bf16.mxu0 %vm2053_vm8, %v2038_v48 }
 0x159   : > { %v2002_v49 = vpop.permute.xlu1 %2001 }
 0x15d   : > { %v1938_v50 = vpop.permute.xlu0 %1937 }
 0x15e   : > { %v2021_v51 = vsel %vm2005_vm5, %v4308_v35, %v1938_v50 }
 0x15f   : > { %v2040_v53 = vsel %vm2024_vm7, %v2021_v51, %v2002_v49 }
 0x160   : > { %3407 = vmatprep.mubr.msk.bf16.mxu1 %vm2053_vm8, %v2040_v53  ;;  %3472 = vmatmul.mubr.msk.bf16.gmra.mrb[20].mxu0 %vm2053_vm8, %v2040_v53 }
 0x161   : > { %3408 = vmatmul.mubr.msk.bf16.gmra.mrb[24].mxu1 %vm2053_vm8, %v2040_v53  ;;  %3475 = vmatprep.mubr.msk.bf16.mxu0 %vm2053_vm8, %v2040_v53 }
 0x16b   : > { %v2004_v29 = vpop.permute.xlu1 %2003 }
 0x16f   : > { %v1940_v54 = vpop.permute.xlu0 %1939 }
 0x170   : > { %v2023_v17 = vsel %vm2005_vm5, %v4341_v27, %v1940_v54 }
 0x171   : > { %v2042_v57 = vsel %vm2024_vm7, %v2023_v17, %v2004_v29 }
 0x172   : > { %3411 = vmatprep.mubr.msk.bf16.mxu1 %vm2053_vm8, %v2042_v57  ;;  %3476 = vmatmul.mubr.msk.bf16.gmra.mrb[24].mxu0 %vm2053_vm8, %v2042_v57 }
 0x173   : > { %3412 = vmatmul.mubr.msk.bf16.gmra.mrb[28].mxu1 %vm2053_vm8, %v2042_v57  ;;  %3479 = vmatprep.mubr.msk.bf16.mxu0 %vm2053_vm8, %v2042_v57 }
 0x174   : > { %3433 = vmatprep.mubr.msk.bf16.mxu1 %vm2053_vm8, %v2034_v43 }
 0x17a   : > { %3480 = vmatmul.mubr.msk.bf16.gmra.mrb[28].mxu0 %vm2053_vm8, %v4325_v0 }
 0x17b   : > { %3434 = vmatmul.mubr.msk.bf16.vlgmr.msra.gmra.mrb[16].mxu1 %vm2053_vm8, %v2036_v52 }
 0x17c   : > { %3437 = vmatprep.mubr.msk.bf16.mxu1 %vm2053_vm8, %v2036_v52 }
 0x183   : > { %3438 = vmatmul.mubr.msk.bf16.gmra.mrb[20].mxu1 %vm2053_vm8, %v2038_v48 }
 0x184   : > { %3441 = vmatprep.mubr.msk.bf16.mxu1 %vm2053_vm8, %v2038_v48 }
 0x18b   : > { %3442 = vmatmul.mubr.msk.bf16.gmra.mrb[24].mxu1 %vm2053_vm8, %v2040_v53 }
 0x18c   : > { %3445 = vmatprep.mubr.msk.bf16.mxu1 %vm2053_vm8, %v2040_v53 }
 0x193   : > { %3446 = vmatmul.mubr.msk.bf16.gmra.mrb[28].mxu1 %vm2053_vm8, %v2042_v57 }
 0x1d0   : > { %v3385_v35 = vpop.f32.mrb[0].mxu1 }
 0x1d1   : > { %v2108_v58 = vpop.f32.mrb[1].mxu1 }
 0x1d2   : > { %v3386_v59 = vpop.f32.mrb[2].mxu1 }
 0x1d3   : > { %v2111_v60 = vpop.f32.mrb[3].mxu1 }
 0x1de   : > { %v3389_v61 = vpop.f32.mrb[4].mxu1 }
 0x1df   : > { %v2124_v62 = vpop.f32.mrb[5].mxu1 }
 0x1e0   : > { %v3390_v63 = vpop.f32.mrb[6].mxu1 }
 0x1e1   : > { %v2127_v0 = vpop.f32.mrb[7].mxu1 }
 0x1ee   : > { %v3393_v1 = vpop.f32.mrb[8].mxu1 }
 0x1ef   : > { %v2140_v4 = vpop.f32.mrb[9].mxu1 }
 0x1f0   : > { %v3394_v2 = vpop.f32.mrb[10].mxu1 }
 0x1f1   : > { %v2143_v5 = vpop.f32.mrb[11].mxu1 }
 0x200   : > { %v3397_v55 = vpop.f32.mrb[12].mxu1 }
 0x201   : > { %v2156_v6 = vpop.f32.mrb[13].mxu1 }
 0x202   : > { %v3398_v7 = vpop.f32.mrb[14].mxu1 }
 0x203   : > { %v2159_v9 = vpop.f32.mrb[15].mxu1 }
 0x207   : > { %v3453_v10 = vpop.f32.mrb[0].mxu0 }
 0x208   : > { %v4423_v11 = vadd.f32 %v3453_v10, %v3385_v35  ;;  %v2451_v12 = vpop.f32.mrb[1].mxu0 }
 0x209   : > { %v4426_v13 = vadd.f32 %v2451_v12, %v2108_v58  ;;  %v3454_v14 = vpop.f32.mrb[2].mxu0 }
 0x20a   : > { %v4428_v15 = vadd.f32 %v3454_v14, %v3386_v59  ;;  %v2454_v27 = vpop.f32.mrb[3].mxu0 }
 0x20b   : > { %v4430_v30 = vadd.f32 %v2454_v27, %v2111_v60 }
 0x20c   : > { %v3243_v20 = vpack.c.bf16 %v4428_v15, %v4423_v11 }
 0x20d   : > { %v3238_v16 = vpack.c.bf16 %v4430_v30, %v4426_v13  ;;  %v2770_v34 = vadd.f32 %v4430_v30, %v4426_v13 }
 0x20e   : > { %3315 = vst [vmem:[%s4436_s9 + $0x8] sm:$0xff] %v3243_v20  }
 0x20f   : > { %3239 = vst [vmem:[%s4436_s9] sm:$0xff] %v3238_v16   ;;  %v3457_v18 = vpop.f32.mrb[4].mxu0  ;;  %v2771_v31 = vadd.f32 %v4423_v11, %v2770_v34 }
 0x210   : > { %v4440_v19 = vadd.f32 %v3457_v18, %v3389_v61  ;;  %v2467_v21 = vpop.f32.mrb[5].mxu0 }
 0x211   : > { %v4442_v22 = vadd.f32 %v2467_v21, %v2124_v62  ;;  %v3458_v23 = vpop.f32.mrb[6].mxu0  ;;  %v2772_v26 = vadd.f32 %v4428_v15, %v2771_v31 }
 0x212   : > { %v4444_v24 = vadd.f32 %v3458_v23, %v3390_v63  ;;  %v2470_v3 = vpop.f32.mrb[7].mxu0 }
 0x213   : > { %v4446_v25 = vadd.f32 %v2470_v3, %v2127_v0  ;;  %v2773_v8 = vadd.f32 %v4442_v22, %v2772_v26 }
 0x214   : > { %v3253_v56 = vpack.c.bf16 %v4444_v24, %v4440_v19 }
 0x215   : > { %v3248_v32 = vpack.c.bf16 %v4446_v25, %v4442_v22  ;;  %v2774_v29 = vadd.f32 %v4446_v25, %v2773_v8 }
 0x216   : > { %3317 = vst [vmem:[%s4436_s9 + $0x18] sm:$0xff] %v3253_v56  }
 0x217   : > { %3316 = vst [vmem:[%s4436_s9 + $0x10] sm:$0xff] %v3248_v32   ;;  %v3461_v33 = vpop.f32.mrb[8].mxu0  ;;  %v2775_v35 = vadd.f32 %v4440_v19, %v2774_v29 }
 0x218   : > { %v4456_v36 = vadd.f32 %v3461_v33, %v3393_v1  ;;  %v2483_v37 = vpop.f32.mrb[9].mxu0 }
 0x219   : > { %v4458_v38 = vadd.f32 %v2483_v37, %v2140_v4  ;;  %v3462_v40 = vpop.f32.mrb[10].mxu0  ;;  %v2776_v59 = vadd.f32 %v4444_v24, %v2775_v35 }
 0x21a   : > { %v4461_v41 = vadd.f32 %v3462_v40, %v3394_v2  ;;  %v2486_v28 = vpop.f32.mrb[11].mxu0 }
 0x21b   : > { %v4463_v42 = vadd.f32 %v2486_v28, %v2143_v5  ;;  %v2777_v60 = vadd.f32 %v4458_v38, %v2776_v59 }
 0x21c   : > { %v3263_v39 = vpack.c.bf16 %v4461_v41, %v4456_v36 }
 0x21d   : > { %v3258_v43 = vpack.c.bf16 %v4463_v42, %v4458_v38  ;;  %v2778_v0 = vadd.f32 %v4463_v42, %v2777_v60 }
 0x21e   : > { %3319 = vst [vmem:[%s4436_s9 + $0x28] sm:$0xff] %v3263_v39  }
 0x21f   : > { %3318 = vst [vmem:[%s4436_s9 + $0x20] sm:$0xff] %v3258_v43   ;;  %v3465_v44 = vpop.f32.mrb[12].mxu0  ;;  %v2779_v4 = vadd.f32 %v4456_v36, %v2778_v0 }
 0x220   : > { %v4472_v45 = vadd.f32 %v3465_v44, %v3397_v55  ;;  %v2499_v52 = vpop.f32.mrb[13].mxu0 }
 0x221   : > { %v4474_v46 = vadd.f32 %v2499_v52, %v2156_v6  ;;  %v3466_v47 = vpop.f32.mrb[14].mxu0  ;;  %v2780_v2 = vadd.f32 %v4461_v41, %v2779_v4 }
 0x222   : > { %v4477_v48 = vadd.f32 %v3466_v47, %v3398_v7  ;;  %v2502_v49 = vpop.f32.mrb[15].mxu0 }
 0x223   : > { %v4479_v50 = vadd.f32 %v2502_v49, %v2159_v9  ;;  %v2781_v5 = vadd.f32 %v4474_v46, %v2780_v2 }
 0x224   : > { %v3273_v51 = vpack.c.bf16 %v4477_v48, %v4472_v45 }
 0x225   : > { %v3268_v53 = vpack.c.bf16 %v4479_v50, %v4474_v46  ;;  %v2782_v6 = vadd.f32 %v4479_v50, %v2781_v5 }
 0x226   : > { %3321 = vst [vmem:[%s4436_s9 + $0x38] sm:$0xff] %v3273_v51  }
 0x227   : > { %3320 = vst [vmem:[%s4436_s9 + $0x30] sm:$0xff] %v3268_v53   ;;  %v3469_v54 = vpop.f32.mrb[16].mxu0  ;;  %v2783_v12 = vadd.f32 %v4472_v45, %v2782_v6 }
 0x228   : > { %v2515_v17 = vpop.f32.mrb[17].mxu0 }
 0x229   : > { %v3470_v57 = vpop.f32.mrb[18].mxu0  ;;  %v2784_v20 = vadd.f32 %v4477_v48, %v2783_v12 }
 0x22a   : > { %v2518_v58 = vpop.f32.mrb[19].mxu0 }
 0x233   : > { %v3473_v61 = vpop.f32.mrb[20].mxu0 }
 0x234   : > { %v2531_v62 = vpop.f32.mrb[21].mxu0 }
 0x235   : > { %v3474_v63 = vpop.f32.mrb[22].mxu0 }
 0x236   : > { %v2534_v1 = vpop.f32.mrb[23].mxu0 }
 0x245   : > { %v3477_v55 = vpop.f32.mrb[24].mxu0 }
 0x246   : > { %v2547_v7 = vpop.f32.mrb[25].mxu0 }
 0x247   : > { %v3478_v9 = vpop.f32.mrb[26].mxu0 }
 0x248   : > { %v2550_v10 = vpop.f32.mrb[27].mxu0 }
 0x24d   : > { %v3481_v14 = vpop.f32.mrb[28].mxu0 }
 0x24e   : > { %v3435_v27 = vpop.f32.mrb[16].mxu1  ;;  %v2563_v16 = vpop.f32.mrb[29].mxu0 }
 0x24f   : > { %v4498_v18 = vadd.f32 %v3469_v54, %v3435_v27  ;;  %v2343_v21 = vpop.f32.mrb[17].mxu1  ;;  %v3482_v23 = vpop.f32.mrb[30].mxu0 }
 0x250   : > { %v4500_v3 = vadd.f32 %v2515_v17, %v2343_v21  ;;  %v3436_v56 = vpop.f32.mrb[18].mxu1  ;;  %v2566_v32 = vpop.f32.mrb[31].mxu0 }
 0x251   : > { %v4502_v34 = vadd.f32 %v3470_v57, %v3436_v56  ;;  %v2346_v33 = vpop.f32.mrb[19].mxu1 }
 0x252   : > { %v2785_v37 = vadd.f32 %v4500_v3, %v2784_v20  ;;  %v4505_v40 = vadd.f32 %v2518_v58, %v2346_v33 }
 0x253   : > { %v3283_v31 = vpack.c.bf16 %v4502_v34, %v4498_v18 }
 0x254   : > { %v3278_v28 = vpack.c.bf16 %v4505_v40, %v4500_v3  ;;  %v2786_v39 = vadd.f32 %v4505_v40, %v2785_v37 }
 0x255   : > { %3323 = vst [vmem:[%s4436_s9 + $0x48] sm:$0xff] %v3283_v31  }
 0x256   : > { %3322 = vst [vmem:[%s4436_s9 + $0x40] sm:$0xff] %v3278_v28   ;;  %v2787_v43 = vadd.f32 %v4498_v18, %v2786_v39  ;;  %v3439_v26 = vpop.f32.mrb[20].mxu1 }
 0x257   : > { %v4515_v44 = vadd.f32 %v3473_v61, %v3439_v26  ;;  %v2359_v52 = vpop.f32.mrb[21].mxu1 }
 0x258   : > { %v4517_v47 = vadd.f32 %v2531_v62, %v2359_v52  ;;  %v2788_v8 = vadd.f32 %v4502_v34, %v2787_v43  ;;  %v3440_v49 = vpop.f32.mrb[22].mxu1 }
 0x259   : > { %v4520_v51 = vadd.f32 %v3474_v63, %v3440_v49  ;;  %v2362_v53 = vpop.f32.mrb[23].mxu1 }
 0x25a   : > { %v2789_v29 = vadd.f32 %v4517_v47, %v2788_v8  ;;  %v4523_v54 = vadd.f32 %v2534_v1, %v2362_v53 }
 0x25b   : > { %v3293_v17 = vpack.c.bf16 %v4520_v51, %v4515_v44 }
 0x25c   : > { %v3288_v57 = vpack.c.bf16 %v4523_v54, %v4517_v47  ;;  %v2790_v35 = vadd.f32 %v4523_v54, %v2789_v29 }
 0x25d   : > { %3325 = vst [vmem:[%s4436_s9 + $0x58] sm:$0xff] %v3293_v17  }
 0x25e   : > { %3324 = vst [vmem:[%s4436_s9 + $0x50] sm:$0xff] %v3288_v57   ;;  %v2791_v58 = vadd.f32 %v4515_v44, %v2790_v35  ;;  %v3443_v59 = vpop.f32.mrb[24].mxu1 }
 0x25f   : > { %v4533_v60 = vadd.f32 %v3477_v55, %v3443_v59  ;;  %v2375_v61 = vpop.f32.mrb[25].mxu1 }
 0x260   : > { %v4535_v62 = vadd.f32 %v2547_v7, %v2375_v61  ;;  %v2792_v63 = vadd.f32 %v4520_v51, %v2791_v58  ;;  %v3444_v0 = vpop.f32.mrb[26].mxu1 }
 0x261   : > { %v4538_v1 = vadd.f32 %v3478_v9, %v3444_v0  ;;  %v2378_v4 = vpop.f32.mrb[27].mxu1 }
 0x262   : > { %v2793_v2 = vadd.f32 %v4535_v62, %v2792_v63  ;;  %v4541_v5 = vadd.f32 %v2550_v10, %v2378_v4 }
 0x263   : > { %v3303_v6 = vpack.c.bf16 %v4538_v1, %v4533_v60 }
 0x264   : > { %v3298_v55 = vpack.c.bf16 %v4541_v5, %v4535_v62  ;;  %v2794_v7 = vadd.f32 %v4541_v5, %v2793_v2 }
 0x265   : > { %3327 = vst [vmem:[%s4436_s9 + $0x68] sm:$0xff] %v3303_v6  }
 0x266   : > { %3326 = vst [vmem:[%s4436_s9 + $0x60] sm:$0xff] %v3298_v55   ;;  %v2795_v9 = vadd.f32 %v4533_v60, %v2794_v7  ;;  %v3447_v12 = vpop.f32.mrb[28].mxu1 }
 0x267   : > { %v4551_v27 = vadd.f32 %v3481_v14, %v3447_v12  ;;  %v2391_v20 = vpop.f32.mrb[29].mxu1 }
 0x268   : > { %v4553_v10 = vadd.f32 %v2563_v16, %v2391_v20  ;;  %v2796_v21 = vadd.f32 %v4538_v1, %v2795_v9  ;;  %v3448_v56 = vpop.f32.mrb[30].mxu1 }
 0x269   : > { %v4557_v33 = vadd.f32 %v3482_v23, %v3448_v56  ;;  %v2394_v37 = vpop.f32.mrb[31].mxu1 }
 0x26a   : > { %v2797_v31 = vadd.f32 %v4553_v10, %v2796_v21  ;;  %v4561_v28 = vadd.f32 %v2566_v32, %v2394_v37 }
 0x26b   : > { %v3313_v14 = vpack.c.bf16 %v4557_v33, %v4551_v27 }
 0x26c   : > { %v3308_v16 = vpack.c.bf16 %v4561_v28, %v4553_v10  ;;  %v2798_v23 = vadd.f32 %v4561_v28, %v2797_v31 }
 0x26d   : > { %3329 = vst [vmem:[%s4436_s9 + $0x78] sm:$0xff] %v3313_v14  }
 0x26e   : > { %3328 = vst [vmem:[%s4436_s9 + $0x70] sm:$0xff] %v3308_v16   ;;  %v2799_v32 = vadd.f32 %v4551_v27, %v2798_v23 }
 0x26f   : > { %3696 = shalt.err (!%p3693_p7)
}
 0x270   : > { %s3697_s7 = scalar_lea.hbm %s4568_s27, 2048  ;;  %s3701_s18 = scalar_lea.hbm %s4726_s2, 4096 }
 0x271   : > { %p3698_p9 = scmp.ne.s32.totalorder %s4568_s27, %s3697_s7  ;;  %p3702_p5 = scmp.lt.u32.totalorder %s4568_s27, %s4726_s2 }
 0x272   : > { %p3703_p11 = scmp.lt.u32.totalorder %s3701_s18, %s3697_s7  ;;  %p3705_p4 = scmp.lt.u32.totalorder %s3697_s7, %s4568_s27 }
 0x273   : > { %p3699_p1 = pnand %p3698_p9, %p3912_p12 }
 0x274   : > { %p3704_p2 = por %p3703_p11, %p3702_p5 }
 0x275   : > { %p3700_p0 = pneg %p3699_p1 }
 0x276   : > { %p3706_p6 = por %p3705_p4, %p3704_p2 }
 0x278   : > { %p3707_p8 = pnand %p3706_p6, %p3700_p0 }
 0x27a   : > { %3710 = shalt.err (!%p3707_p8)
}
 0x27b   : > { %s3796_s4 = smov 64   ;;  %v2800_v39 = vadd.f32 %v4557_v33, %v2799_v32  ;;  %s2918_s29 = scalar_lea.sflag [#allocation9], %s3963_s6 }
 0x27c   : > { %3559 = dma.vmem_to_hbm [thread:$0]  (%p3912_p12), %s4573_s25, 2048, %s4568_s27, %s2913_s28, %s3796_s4, %s3796_s4, %s3794_s20  }
 0x27d   : > { %v2801_v43 = vrot.slane %v2800_v39, 4  ;;  %s3070_s20 = sshll.u32 %s3963_s6, 1  ;;  %s3198_s25 = sshll.u32 %s3839_s16, 5 }
 0x27e   : > { %s214_s26 = scalar_lea.vmem [#allocation8], %s3070_s20  ;;  %s4678_s23 = scalar_lea.hbm %s4727_s3, %s3198_s25 }
 0x27f   : > { %v2802_v26 = vadd.f32 %v2801_v43, %v2800_v39  ;;  %s2947_s5 = sshll.u32 %s214_s26, 4  ;;  %s3797_s16 = smov [#allocation8]   ;;  %s4680_s5 = int_to_ptr.vmem [resolvable:$true] %s2947_s5 }
 0x280   : > { %s3711_s30 = scalar_lea.vmem %s4680_s5, 32  ;;  %s3715_s22 = sshll.u32 %s3797_s16, 4  ;;  %s3716_s22 = int_to_ptr.vmem [resolvable:$false] %s3715_s22 }
 0x281   : > { %v2803_v52 = vrot.slane %v2802_v26, 2  ;;  %p3712_p10 = scmp.ne.s32.totalorder %s4680_s5, %s3711_s30  ;;  %s3717_s7 = scalar_lea.vmem %s3716_s22, 64 }
 0x282   : > { %p3718_p7 = scmp.lt.s32.totalorder %s4680_s5, %s3716_s22  ;;  %p3719_p9 = scmp.lt.s32.totalorder %s3717_s7, %s3711_s30 }
 0x283   : > { %v2804_v8 = vadd.f32 %v2803_v52, %v2802_v26  ;;  %p3713_p13 = pnand %p3712_p10, %p3912_p12 }
 0x284   : > { %p3720_p1 = por %p3719_p9, %p3718_p7 }
 0x285   : > { %v2805_v49 = vrot.slane %v2804_v8, 1  ;;  %p3714_p3 = pneg %p3713_p13 }
 0x287   : > { %v4604_v53 = vadd.f32 %v2805_v49, %v2804_v8  ;;  %p3721_p0 = pnand %p3720_p1, %p3714_p3 }
 0x289   : > { %v4607_v29 = vmul.f32 0.00390625, %v4604_v53 }
 0x28b   : > { %v2808_v17 = vsub.f32 %v4426_v13, %v4607_v29  ;;  %v2809_v57 = vsub.f32 %v4430_v30, %v4607_v29  ;;  %v2810_v35 = vsub.f32 %v4423_v11, %v4607_v29  ;;  %v2811_v61 = vsub.f32 %v4428_v15, %v4607_v29 }
 0x28c   : > { %v2812_v63 = vsub.f32 %v4442_v22, %v4607_v29  ;;  %v2813_v2 = vsub.f32 %v4446_v25, %v4607_v29  ;;  %v2814_v30 = vsub.f32 %v4440_v19, %v4607_v29  ;;  %v2815_v7 = vsub.f32 %v4444_v24, %v4607_v29 }
 0x28d   : > { %v2840_v58 = vmul.f32 %v2808_v17, %v2808_v17  ;;  %v2841_v59 = vmul.f32 %v2809_v57, %v2809_v57  ;;  %v2842_v0 = vmul.f32 %v2810_v35, %v2810_v35  ;;  %v2843_v13 = vmul.f32 %v2811_v61, %v2811_v61 }
 0x28e   : > { %v2844_v55 = vmul.f32 %v2812_v63, %v2812_v63  ;;  %v2845_v9 = vmul.f32 %v2813_v2, %v2813_v2  ;;  %v2816_v22 = vsub.f32 %v4458_v38, %v4607_v29  ;;  %v2846_v12 = vmul.f32 %v2814_v30, %v2814_v30 }
 0x28f   : > { %v2872_v4 = vadd.f32 %v2841_v59, %v2840_v58  ;;  %v2817_v25 = vsub.f32 %v4463_v42, %v4607_v29  ;;  %v2847_v21 = vmul.f32 %v2815_v7, %v2815_v7  ;;  %v2818_v19 = vsub.f32 %v4456_v36, %v4607_v29 }
 0x290   : > { %v2848_v37 = vmul.f32 %v2816_v22, %v2816_v22  ;;  %v2819_v24 = vsub.f32 %v4461_v41, %v4607_v29  ;;  %v2820_v38 = vsub.f32 %v4474_v46, %v4607_v29  ;;  %v2821_v42 = vsub.f32 %v4479_v50, %v4607_v29 }
 0x291   : > { %v2873_v6 = vadd.f32 %v2872_v4, %v2842_v0  ;;  %v2849_v14 = vmul.f32 %v2817_v25, %v2817_v25  ;;  %v2850_v23 = vmul.f32 %v2818_v19, %v2818_v19  ;;  %v2822_v36 = vsub.f32 %v4472_v45, %v4607_v29 }
 0x292   : > { %v2851_v39 = vmul.f32 %v2819_v24, %v2819_v24  ;;  %v2852_v26 = vmul.f32 %v2820_v38, %v2820_v38  ;;  %v2823_v41 = vsub.f32 %v4477_v48, %v4607_v29  ;;  %v2853_v8 = vmul.f32 %v2821_v42, %v2821_v42 }
 0x293   : > { %v2874_v11 = vadd.f32 %v2873_v6, %v2843_v13  ;;  %v2824_v46 = vsub.f32 %v4500_v3, %v4607_v29  ;;  %v2854_v17 = vmul.f32 %v2822_v36, %v2822_v36  ;;  %v2825_v50 = vsub.f32 %v4505_v40, %v4607_v29 }
 0x294   : > { %v2855_v35 = vmul.f32 %v2823_v41, %v2823_v41  ;;  %v2826_v45 = vsub.f32 %v4498_v18, %v4607_v29  ;;  %v2827_v48 = vsub.f32 %v4502_v34, %v4607_v29  ;;  %v2828_v3 = vsub.f32 %v4517_v47, %v4607_v29 }
 0x295   : > { %v2875_v15 = vadd.f32 %v2874_v11, %v2844_v55  ;;  %v2856_v59 = vmul.f32 %v2824_v46, %v2824_v46  ;;  %v2857_v63 = vmul.f32 %v2825_v50, %v2825_v50  ;;  %v2829_v40 = vsub.f32 %v4523_v54, %v4607_v29 }
 0x296   : > { %v2858_v4 = vmul.f32 %v2826_v45, %v2826_v45  ;;  %v2859_v13 = vmul.f32 %v2827_v48, %v2827_v48  ;;  %v2830_v18 = vsub.f32 %v4515_v44, %v4607_v29  ;;  %v2860_v30 = vmul.f32 %v2828_v3, %v2828_v3 }
 0x297   : > { %v2876_v20 = vadd.f32 %v2875_v15, %v2845_v9  ;;  %v2831_v34 = vsub.f32 %v4520_v51, %v4607_v29  ;;  %v2861_v11 = vmul.f32 %v2829_v40, %v2829_v40  ;;  %v2832_v47 = vsub.f32 %v4535_v62, %v4607_v29 }
 0x298   : > { %v2862_v9 = vmul.f32 %v2830_v18, %v2830_v18  ;;  %v2833_v54 = vsub.f32 %v4541_v5, %v4607_v29  ;;  %v2834_v44 = vsub.f32 %v4533_v60, %v4607_v29  ;;  %v2835_v51 = vsub.f32 %v4538_v1, %v4607_v29 }
 0x299   : > { %v2877_v56 = vadd.f32 %v2876_v20, %v2846_v12  ;;  %v2863_v22 = vmul.f32 %v2831_v34, %v2831_v34  ;;  %v2864_v20 = vmul.f32 %v2832_v47, %v2832_v47  ;;  %v2836_v62 = vsub.f32 %v4553_v10, %v4607_v29 }
 0x29a   : > { %v2866_v19 = vmul.f32 %v2834_v44, %v2834_v44  ;;  %v2837_v5 = vsub.f32 %v4561_v28, %v4607_v29  ;;  %v2838_v60 = vsub.f32 %v4551_v27, %v4607_v29  ;;  %v2839_v1 = vsub.f32 %v4557_v33, %v4607_v29 }
 0x29b   : > { %v2878_v31 = vadd.f32 %v2877_v56, %v2847_v21  ;;  %v2865_v21 = vmul.f32 %v2833_v54, %v2833_v54 }
 0x29c   : > { %v2869_v38 = vmul.f32 %v2837_v5, %v2837_v5  ;;  %v2870_v10 = vmul.f32 %v2838_v60, %v2838_v60  ;;  %v2871_v42 = vmul.f32 %v2839_v1, %v2839_v1 }
 0x29d   : > { %v2879_v16 = vadd.f32 %v2878_v31, %v2848_v37  ;;  %v2867_v31 = vmul.f32 %v2835_v51, %v2835_v51 }
 0x29f   : > { %v2880_v32 = vadd.f32 %v2879_v16, %v2849_v14  ;;  %v2868_v14 = vmul.f32 %v2836_v62, %v2836_v62 }
 0x2a1   : > { %v2881_v43 = vadd.f32 %v2880_v32, %v2850_v23 }
 0x2a3   : > { %v2882_v52 = vadd.f32 %v2881_v43, %v2851_v39 }
 0x2a5   : > { %v2883_v49 = vadd.f32 %v2882_v52, %v2852_v26 }
 0x2a7   : > { %v2884_v57 = vadd.f32 %v2883_v49, %v2853_v8 }
 0x2a9   : > { %v2885_v58 = vadd.f32 %v2884_v57, %v2854_v17 }
 0x2ab   : > { %v2886_v61 = vadd.f32 %v2885_v58, %v2855_v35 }
 0x2ad   : > { %v2887_v0 = vadd.f32 %v2886_v61, %v2856_v59 }
 0x2af   : > { %v2888_v2 = vadd.f32 %v2887_v0, %v2857_v63 }
 0x2b1   : > { %v2889_v6 = vadd.f32 %v2888_v2, %v2858_v4 }
 0x2b3   : > { %v2890_v55 = vadd.f32 %v2889_v6, %v2859_v13 }
 0x2b5   : > { %v2891_v7 = vadd.f32 %v2890_v55, %v2860_v30 }
 0x2b7   : > { %v2892_v15 = vadd.f32 %v2891_v7, %v2861_v11 }
 0x2b9   : > { %v2893_v12 = vadd.f32 %v2892_v15, %v2862_v9 }
 0x2bb   : > { %v2894_v25 = vadd.f32 %v2893_v12, %v2863_v22 }
 0x2bd   : > { %v2895_v56 = vadd.f32 %v2894_v25, %v2864_v20 }
 0x2bf   : > { %v2896_v37 = vadd.f32 %v2895_v56, %v2865_v21 }
 0x2c1   : > { %v2897_v24 = vadd.f32 %v2896_v37, %v2866_v19 }
 0x2c3   : > { %v2898_v16 = vadd.f32 %v2897_v24, %v2867_v31 }
 0x2c5   : > { %v2899_v23 = vadd.f32 %v2898_v16, %v2868_v14 }
 0x2c7   : > { %v2900_v32 = vadd.f32 %v2899_v23, %v2869_v38 }
 0x2c9   : > { %v2901_v39 = vadd.f32 %v2900_v32, %v2870_v10 }
 0x2cb   : > { %v2902_v28 = vadd.f32 %v2901_v39, %v2871_v42 }
 0x2cd   : > { %v2903_v43 = vrot.slane %v2902_v28, 4 }
 0x2cf   : > { %v2904_v36 = vadd.f32 %v2903_v43, %v2902_v28 }
 0x2d1   : > { %v2905_v26 = vrot.slane %v2904_v36, 2 }
 0x2d3   : > { %v2906_v27 = vadd.f32 %v2905_v26, %v2904_v36 }
 0x2d5   : > { %v2907_v52 = vrot.slane %v2906_v27, 1 }
 0x2d7   : > { %v2908_v41 = vadd.f32 %v2907_v52, %v2906_v27 }
 0x2d9   : > { %v2910_v33 = vsel %vm1793_vm0, %v4604_v53, %v2908_v41 }
 0x2da   : > { %2911 = vst [vmem:[%s214_s26] sm:$0x3] %v2910_v33 }
 0x2db   : > { %3724 = shalt.err (!%p3721_p0)
}
 0x2dc   : > { %s3725_s6 = scalar_lea.hbm %s4678_s23, 32  ;;  %s3729_s18 = scalar_lea.hbm %s4727_s3, 64 }
 0x2dd   : > { %p3726_p5 = scmp.ne.s32.totalorder %s4678_s23, %s3725_s6  ;;  %p3730_p4 = scmp.lt.u32.totalorder %s4678_s23, %s4727_s3 }
 0x2de   : > { %p3731_p6 = scmp.lt.u32.totalorder %s3729_s18, %s3725_s6  ;;  %p3733_p10 = scmp.lt.u32.totalorder %s3725_s6, %s4678_s23 }
 0x2df   : > { %p3727_p11 = pnand %p3726_p5, %p3912_p12 }
 0x2e0   : > { %p3732_p8 = por %p3731_p6, %p3730_p4 }
 0x2e1   : > { %p3728_p2 = pneg %p3727_p11 }
 0x2e2   : > { %p3734_p13 = por %p3733_p10, %p3732_p8 }
 0x2e4   : > { %p3735_p3 = pnand %p3734_p13, %p3728_p2 }
 0x2e6   : > { %3738 = shalt.err (!%p3735_p3)
}
 0x2e7   : > { %3560 = dma.vmem_to_hbm [thread:$0]  (%p3912_p12), %s4680_s5, 32, %s4678_s23, %s2918_s29  }
 0x2e8 PF: > { %s2959_s4 = sand.u32 1, %s3773_s12   ;;  %p4744_p7 = scmp.ne.s32.totalorder %s4732_s19, 0 }
 0x2e9   : > { %p4745_p9 = scmp.ge.s32.totalorder %s3785_s15, 2  ;;  %s2960_s20 = scalar_lea.sflag [#allocation4], %s2959_s4 }
 0x2eb   : > { %p3572_p1 = pnand %p4745_p9, %p4744_p7 }
 0x2ed   : > { %3764 = dma.done.wait (!%p3572_p1), %s2960_s20, 2048  }
 0x2ee   : > { %3766 = vsyncadd (!%p3572_p1), %s2960_s20, 4294965248  ;;  %s2969_s25 = scalar_lea.sflag [#allocation9], %s2959_s4 }
 0x2ef   : > { %3768 = dma.done.wait (!%p3572_p1), %s2969_s25, 32  }
 0x2f0   : > { %3770 = vsyncadd (!%p3572_p1), %s2969_s25, 4294967264  ;;  %p21_p12 = scmp.ge.s32.totalorder %s3874_s24, 4   ;;  %s4746_s12 = smov %s3777_s13 }
 0x2f1   : > { %s4747_s13 = smov %s3781_s14  ;;  %s4748_s14 = smov %s3908_s17 }
 0x2f2   : > { %s4749_s15 = smov %s3874_s24  ;;  %23 = sbr.rel (!%p21_p12) target bundleno = 8 (0x8), region = 96 }
 0x2f9   :  { %2974 = vsyncpa [#allocation3], 1 }
 0x2fa   :  { %2976 = vsyncpa [#allocation3 + $0x1], 1 }
 0x2fb   :  { %2977 = vsyncpa [#allocation6], 1 }
 0x2fc   :  { %2978 = vsyncpa [#allocation4], 1 }
 0x2fd   :  { %2980 = vsyncpa [#allocation4 + $0x1], 1 }
 0x2fe   :  { %2981 = vsyncpa [#allocation9], 1 }
 0x2ff   :  { %2983 = vsyncpa [#allocation9 + $0x1], 1 }

</bundles_post_ra>
